<compile_context>
chip_gen: v7x
topology: tpu7x:2x2x1
jax: 0.10.0
libtpu: 0.0.40
codegen_flags: <defaults>
</compile_context>

<pallas_src>
import functools

import jax
import jax.numpy as jnp
from jax.experimental import pallas as pl
from jax.experimental.pallas import tpu as pltpu

LN_EPS = 1e-5
_SQRT_2_OVER_PI = 0.7978845608028654


def _gelu_tanh(x):
    # TODO(synk): PyTorch nn.GELU() default is the erf-exact form; the tanh
    # approximation (EUP-friendly, always lowers on Mosaic) differs by <~3e-3.
    return 0.5 * x * (1.0 + jnp.tanh(_SQRT_2_OVER_PI * (x + 0.044715 * x * x * x)))


def _round_up(v, m):
    return (v + m - 1) // m * m


def _prenorm_mlp_kernel(x_ref, ln_ref, w1_ref, b1_ref, w2_ref, o_ref, *, inv_d):
    """LayerNorm(D) -> Linear(D,H) -> GELU -> Linear(H,D) on one row tile."""
    x = x_ref[...].astype(jnp.float32)                      # (tm, D) cast up once

    # --- LayerNorm: single reduction sweep (var = E[x^2] - E[x]^2, clamped).
    s1 = jnp.sum(x, axis=-1, keepdims=True)
    s2 = jnp.sum(x * x, axis=-1, keepdims=True)
    mean = s1 * inv_d
    var = jnp.maximum(s2 * inv_d - mean * mean, 0.0)
    inv_std = jax.lax.rsqrt(var + LN_EPS)

    gamma = ln_ref[0:1, :]                                   # (1, D) f32
    beta = ln_ref[1:2, :]
    bias2 = ln_ref[2:3, :]
    y = (x - mean) * inv_std * gamma + beta                  # (tm, D) f32

    # --- Linear1 + GELU. MXU feeds in the weights' dtype, f32 accumulation.
    h = jnp.dot(y.astype(w1_ref.dtype), w1_ref[...],
                preferred_element_type=jnp.float32)
    h = _gelu_tanh(h + b1_ref[...])                          # (tm, Hp) f32

    # --- Linear2 (+ output bias), store directly in the model dtype.
    out = jnp.dot(h.astype(w2_ref.dtype), w2_ref[...],
                  preferred_element_type=jnp.float32)
    o_ref[...] = (out + bias2).astype(o_ref.dtype)


@functools.partial(jax.jit, static_argnames=("block_rows", "mxu_dtype"))
def prenorm_mlp_forward(x, gamma, beta, w1, b1, w2, b2, *,
                        block_rows=256, mxu_dtype=None):
    """x: (B, S, D) -> (B, S, D).  Fused LayerNorm -> Linear -> GELU -> Linear.

    mxu_dtype: optional dtype (e.g. jnp.bfloat16) for the matmul feeds; f32
    accumulation is kept either way.
    """
    B, S, D = x.shape
    H = w1.shape[1]
    N = B * S

    LANE = 128
    SUB = 8 if x.dtype.itemsize >= 4 else 16     # sublane granularity

    # Optional bf16 (or other) MXU feed dtype for the weights.
    if mxu_dtype is not None:
        w1 = w1.astype(mxu_dtype)
        w2 = w2.astype(mxu_dtype)

    # --- Hidden dim: pad weights/biases only (cheap; keeps MXU feeds lane-dense).
    # D stays native: full-array-dim blocks are legal, so x/out need NO lane
    # padding and NO extra HBM pad/slice passes over the activations.
    # TODO(synk): for transformer-sized D on v6e/v7x prefer 256-multiples for
    # the contraction/output dims of the weights.
    Hp = _round_up(H, LANE)
    if Hp != H:
        w1 = jnp.pad(w1, ((0, 0), (0, Hp - H)))
        w2 = jnp.pad(w2, ((0, Hp - H), (0, 0)))
        b1 = jnp.pad(b1, (0, Hp - H))
    b1_p = b1.astype(jnp.float32).reshape(1, Hp)

    # gamma / beta / output bias share (D,) -> one (3, D) grid-invariant input.
    ln_params = jnp.stack([gamma.astype(jnp.float32),
                           beta.astype(jnp.float32),
                           b2.astype(jnp.float32)], axis=0)

    # --- Row tile: multiple of the sublane width, targeting ~8 grid programs
    # (>=2 per v7x TensorCore after megacore sharding) so the DMA pipeline has a
    # steady state, while keeping tiles >=128 rows for HBM efficiency.
    block_rows = _round_up(max(block_rows, SUB), SUB)
    tm = min(block_rows, max(_round_up(pl.cdiv(N, 8), SUB), 128))
    tm = max(SUB, min(tm, _round_up(N, SUB)))
    grid = pl.cdiv(N, tm)
    Np = grid * tm

    x2 = x.reshape(N, D)
    if Np != N:                       # pad rows only when the grid requires it
        x2 = jnp.pad(x2, ((0, Np - N), (0, 0)))

    # Grid-invariant weights don't need double buffers; single-buffer them when
    # they are big enough to matter for the v7x 64 MiB VMEM budget.
    w_bytes = D * Hp * w1.dtype.itemsize + Hp * D * w2.dtype.itemsize
    if w_bytes > (8 << 20):
        w_mode = {"pipeline_mode": pl.Buffered(1)}
        w_bufs = 1
    else:
        w_mode = {}
        w_bufs = 2
    # TODO(synk): for transformer-sized D/H also tile the hidden dim (second
    # 'arbitrary' grid axis + f32 accumulator) instead of materializing the full
    # (tm, Hp) f32 intermediate.

    # Advisory cost hint for XLA's scheduler.
    cost = pl.CostEstimate(
        flops=int(4 * N * D * H + 10 * N * (D + H)),
        transcendentals=int(N * H),
        bytes_accessed=int(2 * N * D * x.dtype.itemsize
                           + D * Hp * w1.dtype.itemsize
                           + Hp * D * w2.dtype.itemsize
                           + (3 * D + Hp) * 4),
    )

    # Scoped-VMEM budget: tiles + resident weights + f32 temporaries + headroom.
    vmem_est = (2 * tm * D * x.dtype.itemsize                  # x tiles
                + 2 * tm * D * x.dtype.itemsize                # out tiles
                + w_bufs * w_bytes                             # W1/W2 residency
                + 2 * (3 * D + Hp) * 4                         # ln params / b1
                + tm * D * 4 + tm * Hp * 4                     # f32 y / h temps
                + (1 << 20))                                   # headroom
    # Cap below physical VMEM: ~48 MiB on v7x (64 MiB/TC), 64 MiB on v5e/v6e.
    try:
        phys_vmem = getattr(pltpu.get_tpu_info(), "vmem_capacity_bytes", 64 << 20)
    except Exception:
        phys_vmem = 64 << 20
    cap = (64 << 20) if phys_vmem > (96 << 20) else (48 << 20)
    vmem_limit = int(min(cap, max(2 * vmem_est, 32 << 20)))

    out2 = pl.pallas_call(
        functools.partial(_prenorm_mlp_kernel, inv_d=1.0 / D),
        out_shape=jax.ShapeDtypeStruct((Np, D), x.dtype),
        grid_spec=pltpu.PrefetchScalarGridSpec(
            num_scalar_prefetch=0,
            grid=(grid,),
            in_specs=[
                pl.BlockSpec((tm, D), lambda i: (i, 0)),             # x row tile
                pl.BlockSpec((3, D), lambda i: (0, 0)),              # gamma/beta/b2
                pl.BlockSpec((D, Hp), lambda i: (0, 0), **w_mode),   # W1 (resident)
                pl.BlockSpec((1, Hp), lambda i: (0, 0)),             # b1
                pl.BlockSpec((Hp, D), lambda i: (0, 0), **w_mode),   # W2 (resident)
            ],
            out_specs=pl.BlockSpec((tm, D), lambda i: (i, 0)),
        ),
        compiler_params=pltpu.CompilerParams(
            dimension_semantics=("parallel",),
            vmem_limit_bytes=vmem_limit),
        cost_estimate=cost,
    )(x2, ln_params, w1, b1_p, w2)

    if Np != N:
        out2 = out2[:N]
    return out2.reshape(B, S, D)


def prenorm_mlp_reference(x, gamma, beta, w1, b1, w2, b2):
    """Pure-JAX reference: PreNorm(LayerNorm) + FeedForward (Linear-GELU-Linear)."""
    xf = x.astype(jnp.float32)
    mean = jnp.mean(xf, axis=-1, keepdims=True)
    var = jnp.mean((xf - mean) ** 2, axis=-1, keepdims=True)
    y = (xf - mean) * jax.lax.rsqrt(var + LN_EPS)
    y = y * gamma + beta
    h = jnp.dot(y, w1, precision=jax.lax.Precision.HIGHEST) + b1
    h = _gelu_tanh(h)
    out = jnp.dot(h, w2, precision=jax.lax.Precision.HIGHEST) + b2
    return out.astype(x.dtype)


if __name__ == "__main__":
    # Shapes consistent with the module: (batch, seq, dim) with dim last,
    # dim = embedding/h_dim = 64, mlp hidden = 512 (FeedForward1 in FNet1).
    B, S, D, H = 4, 128, 64, 512

    key = jax.random.PRNGKey(0)
    kx, kg, kb, k1, kb1, k2, kb2 = jax.random.split(key, 7)

    x = jax.random.normal(kx, (B, S, D), dtype=jnp.float32)
    gamma = 1.0 + 0.1 * jax.random.normal(kg, (D,), dtype=jnp.float32)
    beta = 0.1 * jax.random.normal(kb, (D,), dtype=jnp.float32)
    w1 = jax.random.normal(k1, (D, H), dtype=jnp.float32) / jnp.sqrt(D)
    b1 = 0.1 * jax.random.normal(kb1, (H,), dtype=jnp.float32)
    w2 = jax.random.normal(k2, (H, D), dtype=jnp.float32) / jnp.sqrt(H)
    b2 = 0.1 * jax.random.normal(kb2, (D,), dtype=jnp.float32)

    ref = prenorm_mlp_reference(x, gamma, beta, w1, b1, w2, b2)

    # f32 MXU feeds: bit-faithful path, tight tolerance.
    out = prenorm_mlp_forward(x, gamma, beta, w1, b1, w2, b2)
    out = jax.block_until_ready(out)
    assert out.shape == (B, S, D), out.shape
    max_err = float(jnp.max(jnp.abs(out - ref)))
    assert jnp.allclose(out, ref, atol=1e-3, rtol=1e-3), max_err

    # bf16 MXU feeds (review-recommended fast path): f32 accumulation, looser check.
    out_bf16 = prenorm_mlp_forward(x, gamma, beta, w1, b1, w2, b2,
                                   mxu_dtype=jnp.bfloat16)
    out_bf16 = jax.block_until_ready(out_bf16)
    max_err_bf16 = float(jnp.max(jnp.abs(out_bf16 - ref)))
    assert jnp.allclose(out_bf16, ref, atol=1e-1, rtol=1e-1), max_err_bf16

    print("KERNEL_OK")
</pallas_src>

<mosaic_0001>
module attributes {stable_mosaic.version = 11 : i64} {
  func.func @_prenorm_mlp_kernel(%arg0: i32, %arg1: memref<128x64xf32, #tpu.memory_space<vmem>>, %arg2: memref<3x64xf32, #tpu.memory_space<vmem>>, %arg3: memref<64x512xf32, #tpu.memory_space<vmem>>, %arg4: memref<1x512xf32, #tpu.memory_space<vmem>>, %arg5: memref<512x64xf32, #tpu.memory_space<vmem>>, %arg6: memref<128x64xf32, #tpu.memory_space<vmem>>) attributes {dimension_semantics = [#tpu.dimension_semantics<parallel>], iteration_bounds = array<i64: 4>, scalar_prefetch = 0 : i64, scratch_operands = 0 : i64, tpu.core_type = #tpu.core_type<tc>, window_params = [{transform_indices = @transform_0, window_bounds = array<i64: 128, 64>}, {pipeline_mode = #tpu.pipeline_mode<synchronous>, transform_indices = @transform_1, window_bounds = array<i64: 3, 64>}, {pipeline_mode = #tpu.pipeline_mode<synchronous>, transform_indices = @transform_2, window_bounds = array<i64: 64, 512>}, {pipeline_mode = #tpu.pipeline_mode<synchronous>, transform_indices = @transform_3, window_bounds = array<i64: 1, 512>}, {pipeline_mode = #tpu.pipeline_mode<synchronous>, transform_indices = @transform_4, window_bounds = array<i64: 512, 64>}, {transform_indices = @transform_5, window_bounds = array<i64: 128, 64>}]} {
    %c0 = arith.constant 0 : index
    %c0_0 = arith.constant 0 : index
    %0 = vector.load %arg1[%c0, %c0_0] : memref<128x64xf32, #tpu.memory_space<vmem>>, vector<128x64xf32>
    %cst = arith.constant dense<0.000000e+00> : vector<128xf32>
    %1 = vector.multi_reduction <add>, %0, %cst [1] : vector<128x64xf32> to vector<128xf32>
    %2 = vector.shape_cast %1 : vector<128xf32> to vector<128x1xf32>
    %3 = arith.mulf %0, %0 : vector<128x64xf32>
    %cst_1 = arith.constant dense<0.000000e+00> : vector<128xf32>
    %4 = vector.multi_reduction <add>, %3, %cst_1 [1] : vector<128x64xf32> to vector<128xf32>
    %5 = vector.shape_cast %4 : vector<128xf32> to vector<128x1xf32>
    %cst_2 = arith.constant 1.562500e-02 : f32
    %6 = vector.broadcast %cst_2 : f32 to vector<128x1xf32>
    %7 = arith.mulf %2, %6 : vector<128x1xf32>
    %cst_3 = arith.constant 1.562500e-02 : f32
    %8 = vector.broadcast %cst_3 : f32 to vector<128x1xf32>
    %9 = arith.mulf %5, %8 : vector<128x1xf32>
    %10 = arith.mulf %7, %7 : vector<128x1xf32>
    %11 = arith.subf %9, %10 : vector<128x1xf32>
    %cst_4 = arith.constant 0.000000e+00 : f32
    %12 = vector.broadcast %cst_4 : f32 to vector<128x1xf32>
    %13 = arith.maximumf %11, %12 : vector<128x1xf32>
    %cst_5 = arith.constant 9.99999974E-6 : f32
    %14 = vector.broadcast %cst_5 : f32 to vector<128x1xf32>
    %15 = arith.addf %13, %14 : vector<128x1xf32>
    %16 = math.rsqrt %15 : vector<128x1xf32>
    %c0_6 = arith.constant 0 : index
    %c0_7 = arith.constant 0 : index
    %17 = vector.load %arg2[%c0_6, %c0_7] : memref<3x64xf32, #tpu.memory_space<vmem>>, vector<1x64xf32>
    %c1 = arith.constant 1 : index
    %c0_8 = arith.constant 0 : index
    %18 = vector.load %arg2[%c1, %c0_8] : memref<3x64xf32, #tpu.memory_space<vmem>>, vector<1x64xf32>
    %c2 = arith.constant 2 : index
    %c0_9 = arith.constant 0 : index
    %19 = vector.load %arg2[%c2, %c0_9] : memref<3x64xf32, #tpu.memory_space<vmem>>, vector<1x64xf32>
    %20 = vector.broadcast %7 : vector<128x1xf32> to vector<128x64xf32>
    %21 = arith.subf %0, %20 : vector<128x64xf32>
    %22 = vector.broadcast %16 : vector<128x1xf32> to vector<128x64xf32>
    %23 = arith.mulf %21, %22 : vector<128x64xf32>
    %24 = vector.broadcast %17 : vector<1x64xf32> to vector<128x64xf32>
    %25 = arith.mulf %23, %24 : vector<128x64xf32>
    %26 = vector.broadcast %18 : vector<1x64xf32> to vector<128x64xf32>
    %27 = arith.addf %25, %26 : vector<128x64xf32>
    %c0_10 = arith.constant 0 : index
    %c0_11 = arith.constant 0 : index
    %28 = vector.load %arg3[%c0_10, %c0_11] : memref<64x512xf32, #tpu.memory_space<vmem>>, vector<64x512xf32>
    %cst_12 = arith.constant dense<0.000000e+00> : vector<128x512xf32>
    %29 = tpu.matmul %27, %28, %cst_12 {dimension_numbers = #tpu.dot_dimension_numbers<[1], [0], [0], [1], [0, 0, 1, 1], [], []>} : vector<128x64xf32>, vector<64x512xf32>, vector<128x512xf32> -> vector<128x512xf32>
    %c0_13 = arith.constant 0 : index
    %c0_14 = arith.constant 0 : index
    %30 = vector.load %arg4[%c0_13, %c0_14] : memref<1x512xf32, #tpu.memory_space<vmem>>, vector<1x512xf32>
    %31 = vector.broadcast %30 : vector<1x512xf32> to vector<128x512xf32>
    %32 = arith.addf %29, %31 : vector<128x512xf32>
    %cst_15 = arith.constant 5.000000e-01 : f32
    %33 = vector.broadcast %cst_15 : f32 to vector<128x512xf32>
    %34 = arith.mulf %33, %32 : vector<128x512xf32>
    %cst_16 = arith.constant 4.471500e-02 : f32
    %35 = vector.broadcast %cst_16 : f32 to vector<128x512xf32>
    %36 = arith.mulf %35, %32 : vector<128x512xf32>
    %37 = arith.mulf %36, %32 : vector<128x512xf32>
    %38 = arith.mulf %37, %32 : vector<128x512xf32>
    %39 = arith.addf %32, %38 : vector<128x512xf32>
    %cst_17 = arith.constant 0.797884583 : f32
    %40 = vector.broadcast %cst_17 : f32 to vector<128x512xf32>
    %41 = arith.mulf %40, %39 : vector<128x512xf32>
    %42 = math.tanh %41 : vector<128x512xf32>
    %cst_18 = arith.constant 1.000000e+00 : f32
    %43 = vector.broadcast %cst_18 : f32 to vector<128x512xf32>
    %44 = arith.addf %43, %42 : vector<128x512xf32>
    %45 = arith.mulf %34, %44 : vector<128x512xf32>
    %c0_19 = arith.constant 0 : index
    %c0_20 = arith.constant 0 : index
    %46 = vector.load %arg5[%c0_19, %c0_20] : memref<512x64xf32, #tpu.memory_space<vmem>>, vector<512x64xf32>
    %cst_21 = arith.constant dense<0.000000e+00> : vector<128x64xf32>
    %47 = tpu.matmul %45, %46, %cst_21 {dimension_numbers = #tpu.dot_dimension_numbers<[1], [0], [0], [1], [0, 0, 1, 1], [], []>} : vector<128x512xf32>, vector<512x64xf32>, vector<128x64xf32> -> vector<128x64xf32>
    %48 = vector.broadcast %19 : vector<1x64xf32> to vector<128x64xf32>
    %49 = arith.addf %47, %48 : vector<128x64xf32>
    %c0_22 = arith.constant 0 : index
    %c0_23 = arith.constant 0 : index
    %50 = vector.load %arg6[%c0_22, %c0_23] : memref<128x64xf32, #tpu.memory_space<vmem>>, vector<128x64xf32>
    tpu.vector_store %arg6[%c0_22, %c0_23], %49 {strides = array<i32>} : memref<128x64xf32, #tpu.memory_space<vmem>>, vector<128x64xf32>,
    return
  }
  func.func @transform_0(%arg0: i32) -> (i32, i32) {
    %c0_i32 = arith.constant 0 : i32
    %c0_i32_0 = arith.constant 0 : i32
    return %arg0, %c0_i32 : i32, i32
  }
  func.func @transform_1(%arg0: i32) -> (i32, i32) {
    %c0_i32 = arith.constant 0 : i32
    %c0_i32_0 = arith.constant 0 : i32
    %c0_i32_1 = arith.constant 0 : i32
    return %c0_i32, %c0_i32_0 : i32, i32
  }
  func.func @transform_2(%arg0: i32) -> (i32, i32) {
    %c0_i32 = arith.constant 0 : i32
    %c0_i32_0 = arith.constant 0 : i32
    %c0_i32_1 = arith.constant 0 : i32
    return %c0_i32, %c0_i32_0 : i32, i32
  }
  func.func @transform_3(%arg0: i32) -> (i32, i32) {
    %c0_i32 = arith.constant 0 : i32
    %c0_i32_0 = arith.constant 0 : i32
    %c0_i32_1 = arith.constant 0 : i32
    return %c0_i32, %c0_i32_0 : i32, i32
  }
  func.func @transform_4(%arg0: i32) -> (i32, i32) {
    %c0_i32 = arith.constant 0 : i32
    %c0_i32_0 = arith.constant 0 : i32
    %c0_i32_1 = arith.constant 0 : i32
    return %c0_i32, %c0_i32_0 : i32, i32
  }
  func.func @transform_5(%arg0: i32) -> (i32, i32) {
    %c0_i32 = arith.constant 0 : i32
    %c0_i32_0 = arith.constant 0 : i32
    return %arg0, %c0_i32 : i32, i32
  }
}

</mosaic_0001>

<bundles_post_ra>
// kernel: prenorm_mlp_forward.1
= control target key start
LH: loop header
LB: loop body
LE: loop exit
PB: predicated region body
PF: predicated region fallthrough
CT: control target
= control target key end

     0   :  { %s2484_s18 = smov 0   ;;  %s4056_s0 = inlined_call_operand.vmem [shape: f32[512,64], index: 0, kind: input, shape index: {}]   ;;  %s4057_s1 = inlined_call_operand.vmem [shape: f32[3,64], index: 1, kind: input, shape index: {}]   ;;  %s4058_s2 = inlined_call_operand.vmem [shape: f32[64,512], index: 2, kind: input, shape index: {}]   ;;  %s4059_s3 = inlined_call_operand.vmem [shape: f32[1,512], index: 3, kind: input, shape index: {}]   ;;  %s4060_s4 = inlined_call_operand.vmem [shape: f32[512,64], index: 4, kind: input, shape index: {}]   ;;  %s4061_s5 = inlined_call_operand.vmem [shape: f32[512,64], index: 5, kind: output, shape index: {}]  }
   0x1 LB: > { %s1974_s19 = sadd.s32 4294967295, %s2451_s18   ;;  %p1978_p0 = scmp.ge.s32.totalorder %s2451_s18, 1  ;;  %s2451_s18 = sphi %s2484_s18, %s15_s18  }
   0x2   : > { %p188_p1 = scmp.lt.s32.totalorder %s2451_s18, 5 }
   0x4   : > { %p189_p2 = pnand %p1978_p0, %p188_p1 }
   0x6   : > { %192 = sbr.rel (%p189_p2) target bundleno = 796 (0x31c), region = 40 }
   0xd   : > { %s1979_s20 = sshll.u32 %s1974_s19, 4  ;;  %vm244_vm0 = vcmask 523264   ;;  %v545_v35 = vld [vmem:[%s4058_s2 + $0x8] sm:$0xff]  ;;  %v547_v37 = vld [vmem:[%s4058_s2 + $0x18] sm:$0xff]  ;;  %v544_v40 = vld [vmem:[%s4058_s2] sm:$0xff] }
   0xe   : > { %p217_p3 = scmp.lt.s32.totalorder %s1979_s20, 63  ;;  %v549_v36 = vld [vmem:[%s4058_s2 + $0x28] sm:$0xff]  ;;  %v551_v39 = vld [vmem:[%s4058_s2 + $0x38] sm:$0xff]  ;;  %v548_v41 = vld [vmem:[%s4058_s2 + $0x20] sm:$0xff] }
   0xf   : > { %v2180_v38 = vpack.c.bf16 %v549_v36, %v545_v35  ;;  %v2196_v42 = vpack.c.bf16 %v551_v39, %v547_v37  ;;  %v2182_v43 = vpack.c.bf16 %v548_v41, %v544_v40  ;;  %v546_v44 = vld [vmem:[%s4058_s2 + $0x10] sm:$0xff]  ;;  %v553_v51 = vld [vmem:[%s4058_s2 + $0x48] sm:$0xff]  ;;  %v555_v53 = vld [vmem:[%s4058_s2 + $0x58] sm:$0xff] }
  0x10   : > { %s4209_s20 = smov (!%p217_p3, %s1979_s20), 63  ;;  %v550_v45 = vld [vmem:[%s4058_s2 + $0x30] sm:$0xff]  ;;  %v557_v52 = vld [vmem:[%s4058_s2 + $0x68] sm:$0xff]  ;;  %v559_v55 = vld [vmem:[%s4058_s2 + $0x78] sm:$0xff] }
  0x11   : > { %s1980_s21 = sshll.u32 %s4209_s20, 3  ;;  %v2198_v47 = vpack.c.bf16 %v550_v45, %v546_v44  ;;  %2181 = vmatprep.subr.bf16.mxu0 %v2180_v38  ;;  %2197 = vmatprep.subr.bf16.mxu1 %v2196_v42  ;;  %v2184_v54 = vpack.c.bf16 %v557_v52, %v553_v51  ;;  %v552_v56 = vld [vmem:[%s4058_s2 + $0x40] sm:$0xff]  ;;  %v2200_v58 = vpack.c.bf16 %v559_v55, %v555_v53  ;;  %v554_v60 = vld [vmem:[%s4058_s2 + $0x50] sm:$0xff]  ;;  %v2453_v45 = vmov 0.0  }
  0x12   : > { %s2500_s24 = scalar_lea.vmem %s4056_s0, %s1980_s21  ;;  %2183 = vmatpush1.bf16.msra.mxu0 %v2182_v43  ;;  %v556_v57 = vld [vmem:[%s4058_s2 + $0x60] sm:$0xff]  ;;  %v558_v61 = vld [vmem:[%s4058_s2 + $0x70] sm:$0xff]  ;;  %710 = vmatprep.mubr.f32.mxu0 %v2453_v45  ;;  %s4004_s6 = scalar_lea.vmem %s4061_s5, %s1980_s21 }
  0x13   : > { %v2503_v0 = vld [vmem:[%s2500_s24 + $0x8] sm:$0xff]  ;;  %v2506_v1 = vld [vmem:[%s2500_s24] sm:$0xff]  ;;  %v2509_v2 = vld [vmem:[%s2500_s24 + $0x10] sm:$0xff]  ;;  %2199 = vmatpush1.bf16.msra.mxu1 %v2198_v47  ;;  %v2186_v59 = vpack.c.bf16 %v556_v57, %v552_v56  ;;  %v2202_v63 = vpack.c.bf16 %v558_v61, %v554_v60  ;;  %2185 = vmatprep.subr.bf16.mxu0 %v2184_v54 }
  0x14   : > { %v248_v3 = vsel %vm244_vm0, %v2503_v0, 0.0  ;;  %v245_v4 = vsel %vm244_vm0, %v2506_v1, 0.0  ;;  %v294_v5 = vmul.f32 %v2503_v0, %v2503_v0  ;;  %v293_v6 = vmul.f32 %v2506_v1, %v2506_v1  ;;  %v2524_v10 = vld [vmem:[%s2500_s24 + $0x18] sm:$0xff]  ;;  %v2532_v14 = vld [vmem:[%s2500_s24 + $0x20] sm:$0xff]  ;;  %v2540_v18 = vld [vmem:[%s2500_s24 + $0x28] sm:$0xff]  ;;  %2201 = vmatprep.subr.bf16.mxu1 %v2200_v58  ;;  %871 = vmatprep.mubr.f32.mxu1 %v2453_v45 }
  0x15   : > { %249 = vadd.xlane.f32.xlu1 %v248_v3  ;;  %246 = vadd.xlane.f32.xlu0 %v245_v4  ;;  %v295_v9 = vmul.f32 %v2509_v2, %v2509_v2  ;;  %v251_v11 = vsel %vm244_vm0, %v2509_v2, 0.0  ;;  %v296_v13 = vmul.f32 %v2524_v10, %v2524_v10  ;;  %v254_v15 = vsel %vm244_vm0, %v2524_v10, 0.0  ;;  %v2548_v22 = vld [vmem:[%s2500_s24 + $0x30] sm:$0xff]  ;;  %v2556_v26 = vld [vmem:[%s2500_s24 + $0x38] sm:$0xff]  ;;  %v2564_v30 = vld [vmem:[%s2500_s24 + $0x40] sm:$0xff] }
  0x16   : > { %v312_v7 = vsel %vm244_vm0, %v294_v5, 0.0  ;;  %v309_v8 = vsel %vm244_vm0, %v293_v6, 0.0  ;;  %v297_v17 = vmul.f32 %v2532_v14, %v2532_v14  ;;  %v257_v19 = vsel %vm244_vm0, %v2532_v14, 0.0  ;;  %v2567_v31 = vld [vmem:[%s2500_s24 + $0x48] sm:$0xff]  ;;  %v2599_v46 = vld [vmem:[%s2500_s24 + $0x50] sm:$0xff]  ;;  %v2631_v62 = vld [vmem:[%s2500_s24 + $0x58] sm:$0xff]  ;;  %2187 = vmatpush1.bf16.msra.mxu0 %v2186_v59 }
  0x17   : > { %v315_v12 = vsel %vm244_vm0, %v295_v9, 0.0  ;;  %v318_v16 = vsel %vm244_vm0, %v296_v13, 0.0  ;;  %v298_v21 = vmul.f32 %v2540_v18, %v2540_v18  ;;  %v260_v23 = vsel %vm244_vm0, %v2540_v18, 0.0  ;;  %v561_v6 = vld [vmem:[%s4058_s2 + $0x88] sm:$0xff]  ;;  %2203 = vmatpush1.bf16.msra.mxu1 %v2202_v63  ;;  %v564_v13 = vld [vmem:[%s4058_s2 + $0xa0] sm:$0xff]  ;;  %v570_v38 = vld [vmem:[%s4058_s2 + $0xd0] sm:$0xff] }
  0x18   : > { %v321_v20 = vsel %vm244_vm0, %v297_v17, 0.0  ;;  %v299_v25 = vmul.f32 %v2548_v22, %v2548_v22  ;;  %v263_v27 = vsel %vm244_vm0, %v2548_v22, 0.0  ;;  %v300_v29 = vmul.f32 %v2556_v26, %v2556_v26  ;;  %v562_v17 = vld [vmem:[%s4058_s2 + $0x90] sm:$0xff]  ;;  %v572_v35 = vld [vmem:[%s4058_s2 + $0xe0] sm:$0xff]  ;;  %v2700_v44 = vld [vmem:[%s2500_s24 + $0x68] sm:$0xff] }
  0x19   : > { %313 = vadd.xlane.f32.xlu1 %v312_v7  ;;  %310 = vadd.xlane.f32.xlu0 %v309_v8  ;;  %v324_v24 = vsel %vm244_vm0, %v298_v21, 0.0  ;;  %v266_v32 = vsel %vm244_vm0, %v2556_v26, 0.0  ;;  %v301_v34 = vmul.f32 %v2564_v30, %v2564_v30  ;;  %v269_v48 = vsel %vm244_vm0, %v2564_v30, 0.0  ;;  %v565_v7 = vld [vmem:[%s4058_s2 + $0xa8] sm:$0xff]  ;;  %v563_v8 = vld [vmem:[%s4058_s2 + $0x98] sm:$0xff]  ;;  %v574_v39 = vld [vmem:[%s4058_s2 + $0xf0] sm:$0xff] }
  0x1a   : > { %v327_v28 = vsel %vm244_vm0, %v299_v25, 0.0  ;;  %v330_v33 = vsel %vm244_vm0, %v300_v29, 0.0  ;;  %v302_v50 = vmul.f32 %v2567_v31, %v2567_v31  ;;  %v272_v3 = vsel %vm244_vm0, %v2567_v31, 0.0  ;;  %v571_v29 = vld [vmem:[%s4058_s2 + $0xd8] sm:$0xff]  ;;  %v1560_v60 = vld [vmem:[%s4060_s4 + $0x80] sm:$0xff]  ;;  %v1561_v61 = vld [vmem:[%s4060_s4 + $0x88] sm:$0xff] }
  0x1b   : > { %v333_v49 = vsel %vm244_vm0, %v301_v34, 0.0  ;;  %v303_v5 = vmul.f32 %v2599_v46, %v2599_v46  ;;  %v2188_v9 = vpack.c.bf16 %v565_v7, %v561_v6  ;;  %v304_v25 = vmul.f32 %v2631_v62, %v2631_v62  ;;  %v568_v34 = vld [vmem:[%s4058_s2 + $0xc0] sm:$0xff]  ;;  %v2718_v54 = vld [vmem:[%s2500_s24 + $0x78] sm:$0xff] }
  0x1c   : > { %v336_v4 = vsel %vm244_vm0, %v302_v50, 0.0  ;;  %v2194_v37 = vpack.c.bf16 %v572_v35, %v568_v34  ;;  %v2210_v40 = vpack.c.bf16 %v574_v39, %v570_v38  ;;  %v278_v41 = vsel %vm244_vm0, %v2631_v62, 0.0  ;;  %v2710_v50 = vld [vmem:[%s2500_s24 + $0x70] sm:$0xff] }
  0x1d   : > { %252 = vadd.xlane.f32.xlu0 %v251_v11  ;;  %316 = vadd.xlane.f32.xlu1 %v315_v12  ;;  %v567_v11 = vld [vmem:[%s4058_s2 + $0xb8] sm:$0xff]  ;;  %v560_v12 = vld [vmem:[%s4058_s2 + $0x80] sm:$0xff]  ;;  %v342_v42 = vsel %vm244_vm0, %v304_v25, 0.0  ;;  %v284_v51 = vsel %vm244_vm0, %v2700_v44, 0.0  ;;  %v307_v53 = vmul.f32 %v2710_v50, %v2710_v50  ;;  %v287_v55 = vsel %vm244_vm0, %v2710_v50, 0.0 }
  0x1e   : > { %2189 = vmatprep.subr.bf16.mxu0 %v2188_v9  ;;  %v308_v57 = vmul.f32 %v2718_v54, %v2718_v54  ;;  %v290_v58 = vsel %vm244_vm0, %v2718_v54, 0.0  ;;  %v2212_v63 = vpack.c.bf16 %v1561_v61, %v1560_v60  ;;  %v2765_v61 = vld [vmem:[%s4060_s4] sm:$0xff] }
  0x1f   : > { %v351_v56 = vsel %vm244_vm0, %v307_v53, 0.0 }
  0x20   : > { %v354_v59 = vsel %vm244_vm0, %v308_v57, 0.0 }
  0x21   : > { %255 = vadd.xlane.f32.xlu0 %v254_v15  ;;  %319 = vadd.xlane.f32.xlu1 %v318_v16  ;;  %v2204_v15 = vpack.c.bf16 %v567_v11, %v563_v8  ;;  %v2190_v16 = vpack.c.bf16 %v564_v13, %v560_v12 }
  0x23   : > { %2205 = vmatprep.subr.bf16.mxu1 %v2204_v15  ;;  %2191 = vmatpush1.bf16.msra.mxu0 %v2190_v16 }
  0x25   : > { %258 = vadd.xlane.f32.xlu0 %v257_v19  ;;  %322 = vadd.xlane.f32.xlu1 %v321_v20  ;;  %v566_v19 = vld [vmem:[%s4058_s2 + $0xb0] sm:$0xff]  ;;  %v2663_v20 = vld [vmem:[%s2500_s24 + $0x60] sm:$0xff] }
  0x26   : > { %v2206_v21 = vpack.c.bf16 %v566_v19, %v562_v17  ;;  %v305_v43 = vmul.f32 %v2663_v20, %v2663_v20  ;;  %v281_v47 = vsel %vm244_vm0, %v2663_v20, 0.0 }
  0x28   : > { %2207 = vmatpush1.bf16.msra.mxu1 %v2206_v21 }
  0x29   : > { %261 = vadd.xlane.f32.xlu0 %v260_v23  ;;  %325 = vadd.xlane.f32.xlu1 %v324_v24  ;;  %v275_v23 = vsel %vm244_vm0, %v2599_v46, 0.0  ;;  %v339_v24 = vsel %vm244_vm0, %v303_v5, 0.0 }
  0x2d   : > { %264 = vadd.xlane.f32.xlu0 %v263_v27  ;;  %328 = vadd.xlane.f32.xlu1 %v327_v28  ;;  %v569_v27 = vld [vmem:[%s4058_s2 + $0xc8] sm:$0xff] }
  0x2e   : > { %v573_v28 = vld [vmem:[%s4058_s2 + $0xe8] sm:$0xff] }
  0x31   : > { %267 = vadd.xlane.f32.xlu0 %v266_v32  ;;  %331 = vadd.xlane.f32.xlu1 %v330_v33  ;;  %v2192_v32 = vpack.c.bf16 %v573_v28, %v569_v27  ;;  %v575_v33 = vld [vmem:[%s4058_s2 + $0xf8] sm:$0xff] }
  0x32   : > { %v2208_v36 = vpack.c.bf16 %v575_v33, %v571_v29 }
  0x33   : > { %2193 = vmatprep.subr.bf16.mxu0 %v2192_v32 }
  0x34   : > { %2209 = vmatprep.subr.bf16.mxu1 %v2208_v36  ;;  %2195 = vmatpush1.bf16.msra.mxu0 %v2194_v37 }
  0x35   : > { %270 = vadd.xlane.f32.xlu0 %v269_v48  ;;  %334 = vadd.xlane.f32.xlu1 %v333_v49  ;;  %v345_v48 = vsel %vm244_vm0, %v305_v43, 0.0  ;;  %v306_v49 = vmul.f32 %v2700_v44, %v2700_v44 }
  0x36   : > { %2211 = vmatpush1.bf16.msra.mxu1 %v2210_v40  ;;  %2213 = vmatprep.subr.bf16.mxu0 %v2212_v63  ;;  %v2770_v63 = vld [vmem:[%s4060_s4 + $0x8] sm:$0xff] }
  0x37   : > { %v348_v52 = vsel %vm244_vm0, %v306_v49, 0.0 }
  0x39   : > { %273 = vadd.xlane.f32.xlu0 %v272_v3  ;;  %337 = vadd.xlane.f32.xlu1 %v336_v4  ;;  %v1592_v3 = vld [vmem:[%s4060_s4 + $0x180] sm:$0xff]  ;;  %v1593_v4 = vld [vmem:[%s4060_s4 + $0x188] sm:$0xff] }
  0x3a   : > { %v2244_v5 = vpack.c.bf16 %v1593_v4, %v1592_v3 }
  0x3c   : > { %2245 = vmatprep.subr.bf16.mxu1 %v2244_v5 }
  0x3d   : > { %276 = vadd.xlane.f32.xlu0 %v275_v23  ;;  %340 = vadd.xlane.f32.xlu1 %v339_v24 }
  0x41   : > { %279 = vadd.xlane.f32.xlu0 %v278_v41  ;;  %343 = vadd.xlane.f32.xlu1 %v342_v42 }
  0x45   : > { %282 = vadd.xlane.f32.xlu0 %v281_v47  ;;  %346 = vadd.xlane.f32.xlu1 %v345_v48 }
  0x49   : > { %285 = vadd.xlane.f32.xlu0 %v284_v51  ;;  %349 = vadd.xlane.f32.xlu1 %v348_v52 }
  0x4d   : > { %288 = vadd.xlane.f32.xlu0 %v287_v55  ;;  %352 = vadd.xlane.f32.xlu1 %v351_v56 }
  0x51   : > { %291 = vadd.xlane.f32.xlu0 %v290_v58  ;;  %355 = vadd.xlane.f32.xlu1 %v354_v59 }
  0xa2   : > { %v250_v6 = vpop.xlane.xlu1 %249  ;;  %v247_v7 = vpop.xlane.xlu0 %246 }
  0xa3   : > { %v2740_v8 = vmul.f32 0.015625, %v250_v6  ;;  %v2742_v9 = vmul.f32 0.015625, %v247_v7  ;;  %v2777_v6 = vld [vmem:[%s4057_s1] ss:$0 sm:$0xff] }
  0xa4   : > { %v2782_v7 = vld [vmem:[%s4060_s4 + $0x100] sm:$0xff] }
  0xa5   : > { %v390_v11 = vmul.f32 %v2740_v8, %v2740_v8  ;;  %v389_v15 = vmul.f32 %v2742_v9, %v2742_v9 }
  0xa6   : > { %v314_v12 = vpop.xlane.xlu1 %313  ;;  %v311_v13 = vpop.xlane.xlu0 %310 }
  0xa7   : > { %v374_v16 = vmul.f32 0.015625, %v314_v12  ;;  %v373_v17 = vmul.f32 0.015625, %v311_v13  ;;  %v2792_v12 = vld [vmem:[%s4060_s4 + $0x90] sm:$0xff] }
  0xa9   : > { %v406_v19 = vsub.f32 %v374_v16, %v390_v11  ;;  %v405_v21 = vsub.f32 %v373_v17, %v389_v15  ;;  %v2787_v11 = vld [vmem:[%s4060_s4 + $0x108] sm:$0xff]  ;;  %v473_v15 = vsub.f32 %v2503_v0, %v2740_v8  ;;  %v472_v16 = vsub.f32 %v2506_v1, %v2742_v9 }
  0xaa   : > { %v253_v23 = vpop.xlane.xlu0 %252  ;;  %v317_v24 = vpop.xlane.xlu1 %316 }
  0xab   : > { %v422_v25 = vmax.f32 %v406_v19, 0.0  ;;  %v421_v27 = vmax.f32 %v405_v21, 0.0  ;;  %v2748_v28 = vmul.f32 0.015625, %v253_v23  ;;  %v375_v29 = vmul.f32 0.015625, %v317_v24  ;;  %v2801_v21 = vld [vmem:[%s4060_s4 + $0x98] sm:$0xff]  ;;  %v2806_v23 = vld [vmem:[%s4060_s4 + $0x10] sm:$0xff] }
  0xac   : > { %v2811_v24 = vld [vmem:[%s4060_s4 + $0x18] sm:$0xff] }
  0xad   : > { %v438_v32 = vadd.f32 1e-05, %v422_v25  ;;  %v437_v33 = vadd.f32 1e-05, %v421_v27  ;;  %v391_v34 = vmul.f32 %v2748_v28, %v2748_v28  ;;  %v2818_v25 = vld [vmem:[%s4060_s4 + $0x190] sm:$0xff]  ;;  %v2823_v27 = vld [vmem:[%s4060_s4 + $0x198] sm:$0xff] }
  0xae   : > { %v256_v35 = vpop.xlane.xlu0 %255  ;;  %v320_v36 = vpop.xlane.xlu1 %319 }
  0xaf   : > { %2285 = vrsqrt.f32 %v438_v32  ;;  %v407_v37 = vsub.f32 %v375_v29, %v391_v34  ;;  %v2752_v38 = vmul.f32 0.015625, %v256_v35  ;;  %v376_v39 = vmul.f32 0.015625, %v320_v36  ;;  %v2828_v29 = vld [vmem:[%s4057_s1 + $0x1] ss:$0 sm:$0xff] }
  0xb0   : > { %2287 = vrsqrt.f32 %v437_v33  ;;  %v2214_v34 = vpack.c.bf16 %v2770_v63, %v2765_v61  ;;  %v2246_v35 = vpack.c.bf16 %v2787_v11, %v2782_v7  ;;  %v2880_v63 = vld [vmem:[%s4060_s4 + $0x1a0] sm:$0xff] }
  0xb1   : > { %v423_v40 = vmax.f32 %v407_v37, 0.0  ;;  %v392_v41 = vmul.f32 %v2752_v38, %v2752_v38 }
  0xb2   : > { %v259_v42 = vpop.xlane.xlu0 %258  ;;  %v323_v43 = vpop.xlane.xlu1 %322 }
  0xb3   : > { %v439_v47 = vadd.f32 1e-05, %v423_v40  ;;  %v408_v48 = vsub.f32 %v376_v39, %v392_v41  ;;  %v2756_v49 = vmul.f32 0.015625, %v259_v42  ;;  %v377_v51 = vmul.f32 0.015625, %v323_v43  ;;  %v2841_v40 = vld [vmem:[%s4060_s4 + $0x110] sm:$0xff]  ;;  %v2846_v41 = vld [vmem:[%s4060_s4 + $0x118] sm:$0xff] }
  0xb4   : > { %v2216_v39 = vpack.c.bf16 %v2801_v21, %v2792_v12  ;;  %v2851_v42 = vld [vmem:[%s4060_s4 + $0xa0] sm:$0xff]  ;;  %v474_v43 = vsub.f32 %v2509_v2, %v2748_v28  ;;  %v2873_v2 = vld [vmem:[%s4060_s4 + $0x28] sm:$0xff]  ;;  %v2250_v11 = vpack.c.bf16 %v2846_v41, %v2841_v40  ;;  %v2935_v40 = vld [vmem:[%s4060_s4 + $0x38] sm:$0xff] }
  0xb5   : > { %2289 = vrsqrt.f32 %v439_v47  ;;  %v424_v52 = vmax.f32 %v408_v48, 0.0  ;;  %v393_v53 = vmul.f32 %v2756_v49, %v2756_v49 }
  0xb6   : > { %v262_v55 = vpop.xlane.xlu0 %261  ;;  %v326_v56 = vpop.xlane.xlu1 %325 }
  0xb7   : > { %v440_v57 = vadd.f32 1e-05, %v424_v52  ;;  %v409_v58 = vsub.f32 %v377_v51, %v393_v53  ;;  %v2760_v59 = vmul.f32 0.015625, %v262_v55  ;;  %v378_v60 = vmul.f32 0.015625, %v326_v56  ;;  %v2863_v55 = vld [vmem:[%s4060_s4 + $0xa8] sm:$0xff]  ;;  %v2868_v56 = vld [vmem:[%s4060_s4 + $0x20] sm:$0xff] }
  0xb8   : > { %v2218_v52 = vpack.c.bf16 %v2811_v24, %v2806_v23  ;;  %v2248_v53 = vpack.c.bf16 %v2823_v27, %v2818_v25 }
  0xb9   : > { %v2286_v3 = vpop.eup %2285  ;;  %2291 = vrsqrt.f32 %v440_v57  ;;  %v425_v4 = vmax.f32 %v409_v58, 0.0  ;;  %v394_v5 = vmul.f32 %v2760_v59, %v2760_v59 }
  0xba   : > { %v2288_v13 = vpop.eup %2287  ;;  %v265_v17 = vpop.xlane.xlu0 %264  ;;  %v489_v33 = vmul.f32 %v2286_v3, %v473_v15  ;;  %v2885_v3 = vld [vmem:[%s4060_s4 + $0x1a8] sm:$0xff]  ;;  %v2220_v15 = vpack.c.bf16 %v2863_v55, %v2851_v42  ;;  %v1598_v55 = vld [vmem:[%s4060_s4 + $0x1b0] sm:$0xff] }
  0xbb   : > { %v329_v19 = vpop.xlane.xlu1 %328  ;;  %v441_v0 = vadd.f32 1e-05, %v425_v4  ;;  %v410_v8 = vsub.f32 %v378_v60, %v394_v5  ;;  %v2813_v1 = vmul.f32 0.015625, %v265_v17  ;;  %v488_v32 = vmul.f32 %v2288_v13, %v472_v16  ;;  %v2898_v16 = vld [vmem:[%s4060_s4 + $0x120] sm:$0xff] }
  0xbc   : > { %v379_v9 = vmul.f32 0.015625, %v329_v19  ;;  %v509_v5 = vmul.f32 %v2777_v6, %v489_v33  ;;  %v475_v17 = vsub.f32 %v2524_v10, %v2752_v38  ;;  %v2916_v10 = vld [vmem:[%s4060_s4 + $0xb0] sm:$0xff]  ;;  %v2921_v38 = vld [vmem:[%s4060_s4 + $0xb8] sm:$0xff] }
  0xbd   : > { %2293 = vrsqrt.f32 %v441_v0  ;;  %v426_v36 = vmax.f32 %v410_v8, 0.0  ;;  %v395_v37 = vmul.f32 %v2813_v1, %v2813_v1  ;;  %v508_v51 = vmul.f32 %v2777_v6, %v488_v32 }
  0xbe   : > { %v268_v47 = vpop.xlane.xlu0 %267  ;;  %v2222_v0 = vpack.c.bf16 %v2873_v2, %v2868_v56  ;;  %v2252_v8 = vpack.c.bf16 %v2885_v3, %v2880_v63  ;;  %v529_v41 = vadd.f32 %v2828_v29, %v509_v5  ;;  %v2974_v5 = vld [vmem:[%s4060_s4 + $0xc0] sm:$0xff] }
  0xbf   : > { %v332_v48 = vpop.xlane.xlu1 %331  ;;  %v2290_v28 = vpop.eup %2289  ;;  %v442_v57 = vadd.f32 1e-05, %v426_v36  ;;  %v411_v58 = vsub.f32 %v379_v9, %v395_v37  ;;  %v2875_v60 = vmul.f32 0.015625, %v268_v47  ;;  %v528_v4 = vadd.f32 %v2828_v29, %v508_v51  ;;  %v2911_v9 = vld [vmem:[%s4060_s4 + $0x128] sm:$0xff]  ;;  %v2930_v37 = vld [vmem:[%s4060_s4 + $0x30] sm:$0xff] }
  0xc0   : > { %v380_v61 = vmul.f32 0.015625, %v332_v48  ;;  %v490_v7 = vmul.f32 %v2290_v28, %v474_v43  ;;  %v2254_v51 = vpack.c.bf16 %v2911_v9, %v2898_v16  ;;  %v476_v28 = vsub.f32 %v2532_v14, %v2756_v49  ;;  %v2960_v14 = vld [vmem:[%s4060_s4 + $0x130] sm:$0xff]  ;;  %v2965_v49 = vld [vmem:[%s4060_s4 + $0x138] sm:$0xff] }
  0xc1   : > { %2295 = vrsqrt.f32 %v442_v57  ;;  %v427_v12 = vmax.f32 %v411_v58, 0.0  ;;  %v396_v13 = vmul.f32 %v2875_v60, %v2875_v60  ;;  %1985 = vmatmul.mubr.msk.f32.vlgmr.msra.gmra.mrb[0].mxu0 %vm244_vm0, %v528_v4  ;;  %2001 = vmatmul.mubr.msk.f32.vlgmr.msra.gmra.mrb[0].mxu1 %vm244_vm0, %v528_v4  ;;  %v1599_v57 = vld [vmem:[%s4060_s4 + $0x1b8] sm:$0xff]  ;;  %v477_v9 = vsub.f32 %v2540_v18, %v2760_v59 }
  0xc2   : > { %v271_v19 = vpop.xlane.xlu0 %270  ;;  %716 = vmatprep.mubr.f32.mxu0 %v2453_v45  ;;  %877 = vmatprep.mubr.f32.mxu1 %v2453_v45  ;;  %v510_v42 = vmul.f32 %v2777_v6, %v490_v7  ;;  %v1569_v7 = vld [vmem:[%s4060_s4 + $0xc8] sm:$0xff]  ;;  %v2258_v23 = vpack.c.bf16 %v2965_v49, %v2960_v14 }
  0xc3   : > { %v335_v21 = vpop.xlane.xlu1 %334  ;;  %v2292_v25 = vpop.eup %2291  ;;  %v443_v27 = vadd.f32 1e-05, %v427_v12  ;;  %v412_v32 = vsub.f32 %v380_v61, %v396_v13  ;;  %v2923_v33 = vmul.f32 0.015625, %v271_v19  ;;  %2215 = vmatpush3.bf16.msra.mxu0 %v2214_v34  ;;  %2247 = vmatpush3.bf16.msra.mxu1 %v2246_v35  ;;  %v2228_v24 = vpack.c.bf16 %v1569_v7, %v2974_v5 }
  0xc4   : > { %v381_v36 = vmul.f32 0.015625, %v335_v21  ;;  %v491_v43 = vmul.f32 %v2292_v25, %v475_v17  ;;  %2217 = vmatprep.subr.bf16.mxu0 %v2216_v39  ;;  %2249 = vmatprep.subr.bf16.mxu1 %v2248_v53  ;;  %v2224_v39 = vpack.c.bf16 %v2921_v38, %v2916_v10  ;;  %v2226_v53 = vpack.c.bf16 %v2935_v40, %v2930_v37 }
  0xc5   : > { %2297 = vrsqrt.f32 %v443_v27  ;;  %v428_v47 = vmax.f32 %v412_v32, 0.0  ;;  %v397_v48 = vmul.f32 %v2923_v33, %v2923_v33  ;;  %1986 = vmatmul.mubr.msk.f32.gmra.mrb[2].mxu0 %vm244_vm0, %v529_v41  ;;  %2002 = vmatmul.mubr.msk.f32.gmra.mrb[2].mxu1 %vm244_vm0, %v529_v41  ;;  %v530_v12 = vadd.f32 %v2828_v29, %v510_v42  ;;  %v1552_v27 = vld [vmem:[%s4060_s4 + $0x40] sm:$0xff]  ;;  %v1553_v32 = vld [vmem:[%s4060_s4 + $0x48] sm:$0xff] }
  0xc6   : > { %v274_v34 = vpop.xlane.xlu0 %273  ;;  %722 = vmatprep.mubr.f32.mxu0 %v2453_v45  ;;  %883 = vmatprep.mubr.f32.mxu1 %v2453_v45  ;;  %v511_v13 = vmul.f32 %v2777_v6, %v491_v43  ;;  %v2256_v21 = vpack.c.bf16 %v1599_v57, %v1598_v55  ;;  %v478_v55 = vsub.f32 %v2548_v22, %v2813_v1 }
  0xc7   : > { %v338_v35 = vpop.xlane.xlu1 %337  ;;  %v2294_v58 = vpop.eup %2293  ;;  %v444_v61 = vadd.f32 1e-05, %v428_v47  ;;  %v413_v63 = vsub.f32 %v381_v36, %v397_v48  ;;  %v2967_v3 = vmul.f32 0.015625, %v274_v34  ;;  %2219 = vmatpush3.bf16.msra.mxu0 %v2218_v52  ;;  %2251 = vmatpush3.bf16.msra.mxu1 %v2250_v11  ;;  %v1600_v52 = vld [vmem:[%s4060_s4 + $0x1c0] sm:$0xff]  ;;  %v1601_v11 = vld [vmem:[%s4060_s4 + $0x1c8] sm:$0xff]  ;;  %v2230_v56 = vpack.c.bf16 %v1553_v32, %v1552_v27 }
  0xc8   : > { %v382_v4 = vmul.f32 0.015625, %v338_v35  ;;  %v492_v16 = vmul.f32 %v2294_v58, %v476_v28  ;;  %2221 = vmatprep.subr.bf16.mxu0 %v2220_v15  ;;  %2253 = vmatprep.subr.bf16.mxu1 %v2252_v8  ;;  %v531_v36 = vadd.f32 %v2828_v29, %v511_v13  ;;  %v2260_v48 = vpack.c.bf16 %v1601_v11, %v1600_v52 }
  0xc9   : > { %2299 = vrsqrt.f32 %v444_v61  ;;  %v429_v17 = vmax.f32 %v413_v63, 0.0  ;;  %v398_v19 = vmul.f32 %v2967_v3, %v2967_v3  ;;  %1987 = vmatmul.mubr.msk.f32.gmra.mrb[4].mxu0 %vm244_vm0, %v530_v12  ;;  %2003 = vmatmul.mubr.msk.f32.gmra.mrb[4].mxu1 %vm244_vm0, %v530_v12  ;;  %v479_v58 = vsub.f32 %v2556_v26, %v2875_v60 }
  0xca   : > { %v277_v10 = vpop.xlane.xlu0 %276  ;;  %728 = vmatprep.mubr.f32.mxu0 %v2453_v45  ;;  %889 = vmatprep.mubr.f32.mxu1 %v2453_v45  ;;  %v512_v41 = vmul.f32 %v2777_v6, %v492_v16  ;;  %v480_v16 = vsub.f32 %v2564_v30, %v2923_v33 }
  0xcb   : > { %v341_v38 = vpop.xlane.xlu1 %340  ;;  %v2296_v18 = vpop.eup %2295  ;;  %v445_v59 = vadd.f32 1e-05, %v429_v17  ;;  %v414_v15 = vsub.f32 %v382_v4, %v398_v19  ;;  %v2999_v8 = vmul.f32 0.015625, %v277_v10  ;;  %2223 = vmatpush3.bf16.msra.mxu0 %v2222_v0  ;;  %2255 = vmatpush3.bf16.msra.mxu1 %v2254_v51 }
  0xcc   : > { %v383_v25 = vmul.f32 0.015625, %v341_v38  ;;  %v493_v42 = vmul.f32 %v2296_v18, %v477_v9  ;;  %2225 = vmatprep.subr.bf16.mxu0 %v2224_v39  ;;  %2257 = vmatprep.subr.bf16.mxu1 %v2256_v21  ;;  %v532_v57 = vadd.f32 %v2828_v29, %v512_v41  ;;  %v481_v18 = vsub.f32 %v2567_v31, %v2967_v3 }
  0xcd   : > { %2301 = vrsqrt.f32 %v445_v59  ;;  %v430_v43 = vmax.f32 %v414_v15, 0.0  ;;  %v399_v47 = vmul.f32 %v2999_v8, %v2999_v8  ;;  %1988 = vmatmul.mubr.msk.f32.gmra.mrb[6].mxu0 %vm244_vm0, %v531_v36  ;;  %2004 = vmatmul.mubr.msk.f32.gmra.mrb[6].mxu1 %vm244_vm0, %v531_v36 }
  0xce   : > { %v280_v28 = vpop.xlane.xlu0 %279  ;;  %734 = vmatprep.mubr.f32.mxu0 %v2453_v45  ;;  %895 = vmatprep.mubr.f32.mxu1 %v2453_v45  ;;  %v513_v22 = vmul.f32 %v2777_v6, %v493_v42 }
  0xcf   : > { %v344_v34 = vpop.xlane.xlu1 %343  ;;  %v2298_v2 = vpop.eup %2297  ;;  %v446_v0 = vadd.f32 1e-05, %v430_v43  ;;  %v415_v51 = vsub.f32 %v383_v25, %v399_v47  ;;  %v3020_v35 = vmul.f32 0.015625, %v280_v28  ;;  %2227 = vmatpush3.bf16.msra.mxu0 %v2226_v53  ;;  %2259 = vmatpush3.bf16.msra.mxu1 %v2258_v23 }
  0xd0   : > { %v384_v39 = vmul.f32 0.015625, %v344_v34  ;;  %v494_v1 = vmul.f32 %v2298_v2, %v478_v55  ;;  %2229 = vmatprep.subr.bf16.mxu0 %v2228_v24  ;;  %2261 = vmatprep.subr.bf16.mxu1 %v2260_v48  ;;  %v533_v7 = vadd.f32 %v2828_v29, %v513_v22  ;;  %v482_v48 = vsub.f32 %v2599_v46, %v2999_v8 }
  0xd1   : > { %2303 = vrsqrt.f32 %v446_v0  ;;  %v431_v14 = vmax.f32 %v415_v51, 0.0  ;;  %v400_v49 = vmul.f32 %v3020_v35, %v3020_v35  ;;  %1989 = vmatmul.mubr.msk.f32.gmra.mrb[8].mxu0 %vm244_vm0, %v532_v57  ;;  %2005 = vmatmul.mubr.msk.f32.gmra.mrb[8].mxu1 %vm244_vm0, %v532_v57 }
  0xd2   : > { %v283_v61 = vpop.xlane.xlu0 %282  ;;  %740 = vmatprep.mubr.f32.mxu0 %v2453_v45  ;;  %901 = vmatprep.mubr.f32.mxu1 %v2453_v45  ;;  %v514_v26 = vmul.f32 %v2777_v6, %v494_v1  ;;  %v483_v1 = vsub.f32 %v2631_v62, %v3020_v35 }
  0xd3   : > { %v347_v63 = vpop.xlane.xlu1 %346  ;;  %v2300_v4 = vpop.eup %2299  ;;  %v447_v37 = vadd.f32 1e-05, %v431_v14  ;;  %v416_v40 = vsub.f32 %v384_v39, %v400_v49  ;;  %v3035_v53 = vmul.f32 0.015625, %v283_v61  ;;  %2231 = vmatpush3.bf16.msra.mxu0 %v2230_v56 }
  0xd4   : > { %v385_v5 = vmul.f32 0.015625, %v347_v63  ;;  %v495_v60 = vmul.f32 %v2300_v4, %v479_v58  ;;  %v534_v24 = vadd.f32 %v2828_v29, %v514_v26 }
  0xd5   : > { %2305 = vrsqrt.f32 %v447_v37  ;;  %v432_v12 = vmax.f32 %v416_v40, 0.0  ;;  %v401_v13 = vmul.f32 %v3035_v53, %v3035_v53  ;;  %1990 = vmatmul.mubr.msk.f32.gmra.mrb[10].mxu0 %vm244_vm0, %v533_v7  ;;  %2006 = vmatmul.mubr.msk.f32.gmra.mrb[10].mxu1 %vm244_vm0, %v533_v7  ;;  %v484_v62 = vsub.f32 %v2663_v20, %v3035_v53 }
  0xd6   : > { %v286_v17 = vpop.xlane.xlu0 %285  ;;  %746 = vmatprep.mubr.f32.mxu0 %v2453_v45  ;;  %907 = vmatprep.mubr.f32.mxu1 %v2453_v45  ;;  %v515_v30 = vmul.f32 %v2777_v6, %v495_v60 }
  0xd7   : > { %v350_v19 = vpop.xlane.xlu1 %349  ;;  %v2302_v21 = vpop.eup %2301  ;;  %v448_v9 = vadd.f32 1e-05, %v432_v12  ;;  %v417_v10 = vsub.f32 %v385_v5, %v401_v13  ;;  %v3047_v38 = vmul.f32 0.015625, %v286_v17 }
  0xd8   : > { %v386_v23 = vmul.f32 0.015625, %v350_v19  ;;  %v496_v33 = vmul.f32 %v2302_v21, %v480_v16  ;;  %v535_v42 = vadd.f32 %v2828_v29, %v515_v30 }
  0xd9   : > { %2307 = vrsqrt.f32 %v448_v9  ;;  %v433_v52 = vmax.f32 %v417_v10, 0.0  ;;  %v402_v11 = vmul.f32 %v3047_v38, %v3047_v38  ;;  %1991 = vmatmul.mubr.msk.f32.gmra.mrb[12].mxu0 %vm244_vm0, %v534_v24  ;;  %2007 = vmatmul.mubr.msk.f32.gmra.mrb[12].mxu1 %vm244_vm0, %v534_v24  ;;  %v485_v60 = vsub.f32 %v2700_v44, %v3047_v38 }
  0xda   : > { %v289_v59 = vpop.xlane.xlu0 %288  ;;  %752 = vmatprep.mubr.f32.mxu0 %v2453_v45  ;;  %913 = vmatprep.mubr.f32.mxu1 %v2453_v45  ;;  %v516_v31 = vmul.f32 %v2777_v6, %v496_v33  ;;  %v1584_v33 = vld [vmem:[%s4060_s4 + $0x140] sm:$0xff] }
  0xdb   : > { %v353_v15 = vpop.xlane.xlu1 %352  ;;  %v2304_v25 = vpop.eup %2303  ;;  %v449_v27 = vadd.f32 1e-05, %v433_v52  ;;  %v418_v32 = vsub.f32 %v386_v23, %v402_v11  ;;  %v3059_v36 = vmul.f32 0.015625, %v289_v59  ;;  %v1570_v11 = vld [vmem:[%s4060_s4 + $0xd0] sm:$0xff]  ;;  %v1555_v59 = vld [vmem:[%s4060_s4 + $0x58] sm:$0xff] }
  0xdc   : > { %v387_v41 = vmul.f32 0.015625, %v353_v15  ;;  %v497_v3 = vmul.f32 %v2304_v25, %v481_v18  ;;  %v536_v39 = vadd.f32 %v2828_v29, %v516_v31  ;;  %v1602_v15 = vld [vmem:[%s4060_s4 + $0x1d0] sm:$0xff]  ;;  %v1603_v25 = vld [vmem:[%s4060_s4 + $0x1d8] sm:$0xff]  ;;  %v1572_v31 = vld [vmem:[%s4060_s4 + $0xe0] sm:$0xff] }
  0xdd   : > { %2309 = vrsqrt.f32 %v449_v27  ;;  %v434_v43 = vmax.f32 %v418_v32, 0.0  ;;  %v403_v47 = vmul.f32 %v3059_v36, %v3059_v36  ;;  %1992 = vmatmul.mubr.msk.f32.gmra.mrb[14].mxu0 %vm244_vm0, %v535_v42  ;;  %2008 = vmatmul.mubr.msk.f32.gmra.mrb[14].mxu1 %vm244_vm0, %v535_v42  ;;  %v486_v16 = vsub.f32 %v2710_v50, %v3059_v36  ;;  %v1586_v36 = vld [vmem:[%s4060_s4 + $0x150] sm:$0xff] }
  0xde   : > { %v292_v55 = vpop.xlane.xlu0 %291  ;;  %758 = vmatprep.mubr.f32.mxu0 %v2453_v45  ;;  %919 = vmatprep.mubr.f32.mxu1 %v2453_v45  ;;  %v517_v57 = vmul.f32 %v2777_v6, %v497_v3  ;;  %v2264_v32 = vpack.c.bf16 %v1603_v25, %v1602_v15  ;;  %v1573_v3 = vld [vmem:[%s4060_s4 + $0xe8] sm:$0xff] }
  0xdf   : > { %v356_v28 = vpop.xlane.xlu1 %355  ;;  %v2306_v34 = vpop.eup %2305  ;;  %v450_v56 = vadd.f32 1e-05, %v434_v43  ;;  %v419_v2 = vsub.f32 %v387_v41, %v403_v47  ;;  %v372_v0 = vmul.f32 0.015625, %v292_v55  ;;  %v1587_v41 = vld [vmem:[%s4060_s4 + $0x158] sm:$0xff]  ;;  %v1556_v43 = vld [vmem:[%s4060_s4 + $0x60] sm:$0xff]  ;;  %v2236_v47 = vpack.c.bf16 %v1573_v3, %v1572_v31 }
  0xe0   : > { %v388_v51 = vmul.f32 0.015625, %v356_v28  ;;  %v498_v46 = vmul.f32 %v2306_v34, %v482_v48  ;;  %v537_v61 = vadd.f32 %v2828_v29, %v517_v57  ;;  %v2266_v42 = vpack.c.bf16 %v1587_v41, %v1586_v36  ;;  %v1557_v48 = vld [vmem:[%s4060_s4 + $0x68] sm:$0xff]  ;;  %v1604_v55 = vld [vmem:[%s4060_s4 + $0x1e0] sm:$0xff]  ;;  %v1575_v57 = vld [vmem:[%s4060_s4 + $0xf8] sm:$0xff] }
  0xe1   : > { %2311 = vrsqrt.f32 %v450_v56  ;;  %v435_v8 = vmax.f32 %v419_v2, 0.0  ;;  %v404_v22 = vmul.f32 %v372_v0, %v372_v0  ;;  %1993 = vmatmul.mubr.msk.f32.gmra.mrb[16].mxu0 %vm244_vm0, %v536_v39  ;;  %2009 = vmatmul.mubr.msk.f32.gmra.mrb[16].mxu1 %vm244_vm0, %v536_v39  ;;  %v487_v9 = vsub.f32 %v2718_v54, %v372_v0  ;;  %v1605_v28 = vld [vmem:[%s4060_s4 + $0x1e8] sm:$0xff]  ;;  %v1588_v2 = vld [vmem:[%s4060_s4 + $0x160] sm:$0xff]  ;;  %v1574_v39 = vld [vmem:[%s4060_s4 + $0xf0] sm:$0xff] }
  0xe2   : > { %764 = vmatprep.mubr.f32.mxu0 %v2453_v45  ;;  %925 = vmatprep.mubr.f32.mxu1 %v2453_v45  ;;  %v518_v63 = vmul.f32 %v2777_v6, %v498_v46  ;;  %v2238_v34 = vpack.c.bf16 %v1557_v48, %v1556_v43  ;;  %v2268_v56 = vpack.c.bf16 %v1605_v28, %v1604_v55  ;;  %v1589_v0 = vld [vmem:[%s4060_s4 + $0x168] sm:$0xff]  ;;  %v1606_v46 = vld [vmem:[%s4060_s4 + $0x1f0] sm:$0xff] }
  0xe3   : > { %v2308_v14 = vpop.eup %2307  ;;  %v451_v49 = vadd.f32 1e-05, %v435_v8  ;;  %v420_v58 = vsub.f32 %v388_v51, %v404_v22  ;;  %v2270_v51 = vpack.c.bf16 %v1589_v0, %v1588_v2  ;;  %v2240_v8 = vpack.c.bf16 %v1575_v57, %v1574_v39  ;;  %v1558_v22 = vld [vmem:[%s4060_s4 + $0x70] sm:$0xff] }
  0xe4   : > { %v499_v4 = vmul.f32 %v2308_v14, %v483_v1  ;;  %v538_v5 = vadd.f32 %v2828_v29, %v518_v63  ;;  %v1559_v1 = vld [vmem:[%s4060_s4 + $0x78] sm:$0xff] }
  0xe5   : > { %2313 = vrsqrt.f32 %v451_v49  ;;  %v436_v37 = vmax.f32 %v420_v58, 0.0  ;;  %1994 = vmatmul.mubr.msk.f32.gmra.mrb[18].mxu0 %vm244_vm0, %v537_v61  ;;  %2010 = vmatmul.mubr.msk.f32.gmra.mrb[18].mxu1 %vm244_vm0, %v537_v61  ;;  %v1607_v14 = vld [vmem:[%s4060_s4 + $0x1f8] sm:$0xff]  ;;  %v2242_v49 = vpack.c.bf16 %v1559_v1, %v1558_v22  ;;  %v1590_v61 = vld [vmem:[%s4060_s4 + $0x170] sm:$0xff] }
  0xe6   : > { %770 = vmatprep.mubr.f32.mxu0 %v2453_v45  ;;  %931 = vmatprep.mubr.f32.mxu1 %v2453_v45  ;;  %v519_v7 = vmul.f32 %v2777_v6, %v499_v4  ;;  %v2272_v58 = vpack.c.bf16 %v1607_v14, %v1606_v46  ;;  %v1591_v63 = vld [vmem:[%s4060_s4 + $0x178] sm:$0xff] }
  0xe7   : > { %v2310_v35 = vpop.eup %2309  ;;  %v452_v40 = vadd.f32 1e-05, %v436_v37  ;;  %v2274_v4 = vpack.c.bf16 %v1591_v63, %v1590_v61  ;;  %v578_v37 = vlaneseq }
  0xe8   : > { %v500_v26 = vmul.f32 %v2310_v35, %v484_v62  ;;  %v539_v53 = vadd.f32 %v2828_v29, %v519_v7 }
  0xe9   : > { %2315 = vrsqrt.f32 %v452_v40  ;;  %1995 = vmatmul.mubr.msk.f32.gmra.mrb[20].mxu0 %vm244_vm0, %v538_v5  ;;  %2011 = vmatmul.mubr.msk.f32.gmra.mrb[20].mxu1 %vm244_vm0, %v538_v5  ;;  %v579_v62 = vshrl.u32 %v578_v37, 7  ;;  %v576_v5 = vld [vmem:[%s4059_s3] sm:$0xf] }
  0xea   : > { %776 = vmatprep.mubr.f32.mxu0 %v2453_v45  ;;  %937 = vmatprep.mubr.f32.mxu1 %v2453_v45  ;;  %v520_v12 = vmul.f32 %v2777_v6, %v500_v26 }
  0xeb   : > { %v2312_v20 = vpop.eup %2311  ;;  %v580_v35 = vsub.s32 0, %v579_v62  ;;  %v588_v40 = vsub.s32 2, %v579_v62  ;;  %v584_v7 = vsub.s32 1, %v579_v62  ;;  %v592_v26 = vsub.s32 3, %v579_v62 }
  0xec   : > { %v501_v13 = vmul.f32 %v2312_v20, %v485_v60  ;;  %v540_v17 = vadd.f32 %v2828_v29, %v520_v12 }
  0xed   : > { %1996 = vmatmul.mubr.msk.f32.gmra.mrb[22].mxu0 %vm244_vm0, %v539_v53  ;;  %2012 = vmatmul.mubr.msk.f32.gmra.mrb[22].mxu1 %vm244_vm0, %v539_v53  ;;  %v3208_v60 = vrot.slane %v576_v5, %v580_v35  ;;  %v3210_v20 = vrot.slane %v576_v5, %v588_v40  ;;  %v3212_v53 = vrot.slane %v576_v5, %v584_v7 }
  0xee   : > { %782 = vmatprep.mubr.f32.mxu0 %v2453_v45  ;;  %943 = vmatprep.mubr.f32.mxu1 %v2453_v45  ;;  %v521_v19 = vmul.f32 %v2777_v6, %v501_v13  ;;  %v3214_v12 = vrot.slane %v576_v5, %v592_v26 }
  0xef   : > { %v2314_v44 = vpop.eup %2313 }
  0xf0   : > { %v502_v21 = vmul.f32 %v2314_v44, %v486_v16  ;;  %v541_v10 = vadd.f32 %v2828_v29, %v521_v19 }
  0xf1   : > { %1997 = vmatmul.mubr.msk.f32.gmra.mrb[24].mxu0 %vm244_vm0, %v540_v17  ;;  %2013 = vmatmul.mubr.msk.f32.gmra.mrb[24].mxu1 %vm244_vm0, %v540_v17 }
  0xf2   : > { %788 = vmatprep.mubr.f32.mxu0 %v2453_v45  ;;  %949 = vmatprep.mubr.f32.mxu1 %v2453_v45  ;;  %v522_v38 = vmul.f32 %v2777_v6, %v502_v21 }
  0xf3   : > { %v2316_v50 = vpop.eup %2315 }
  0xf4   : > { %v503_v23 = vmul.f32 %v2316_v50, %v487_v9  ;;  %v542_v54 = vadd.f32 %v2828_v29, %v522_v38 }
  0xf5   : > { %1998 = vmatmul.mubr.msk.f32.gmra.mrb[26].mxu0 %vm244_vm0, %v541_v10  ;;  %2014 = vmatmul.mubr.msk.f32.gmra.mrb[26].mxu1 %vm244_vm0, %v541_v10 }
  0xf6   : > { %794 = vmatprep.mubr.f32.mxu0 %v2453_v45  ;;  %955 = vmatprep.mubr.f32.mxu1 %v2453_v45  ;;  %v523_v24 = vmul.f32 %v2777_v6, %v503_v23  ;;  %v1585_v6 = vld [vmem:[%s4060_s4 + $0x148] sm:$0xff] }
  0xf7   : > { %v2262_v52 = vpack.c.bf16 %v1585_v6, %v1584_v33 }
  0xf8   : > { %v543_v30 = vadd.f32 %v2828_v29, %v523_v24  ;;  %v1554_v29 = vld [vmem:[%s4060_s4 + $0x50] sm:$0xff] }
  0xf9   : > { %1999 = vmatmul.mubr.msk.f32.gmra.mrb[28].mxu0 %vm244_vm0, %v542_v54  ;;  %2015 = vmatmul.mubr.msk.f32.gmra.mrb[28].mxu1 %vm244_vm0, %v542_v54  ;;  %v2234_v27 = vpack.c.bf16 %v1555_v59, %v1554_v29 }
  0xfa   : > { %800 = vmatprep.mubr.f32.mxu0 %v2453_v45  ;;  %961 = vmatprep.mubr.f32.mxu1 %v2453_v45  ;;  %v1571_v45 = vld [vmem:[%s4060_s4 + $0xd8] sm:$0xff] }
  0xfb   : > { %v2232_v18 = vpack.c.bf16 %v1571_v45, %v1570_v11  ;;  %2263 = vmatpush3.bf16.msra.mxu1 %v2262_v52 }
  0xfc   : > { %2265 = vmatprep.subr.bf16.mxu1 %v2264_v32 }
  0xfd   : > { %2000 = vmatmul.mubr.msk.f32.gmra.mrb[30].mxu0 %vm244_vm0, %v543_v30  ;;  %2016 = vmatmul.mubr.msk.f32.gmra.mrb[30].mxu1 %vm244_vm0, %v543_v30 }
  0xfe   : > { %2233 = vmatprep.subr.bf16.mxu0 %v2232_v18 }
  0xff   : > { %2235 = vmatpush3.bf16.msra.mxu0 %v2234_v27  ;;  %2267 = vmatpush3.bf16.msra.mxu1 %v2266_v42 }
 0x100   : > { %2237 = vmatprep.subr.bf16.mxu0 %v2236_v47  ;;  %2269 = vmatprep.subr.bf16.mxu1 %v2268_v56 }
 0x103   : > { %2239 = vmatpush3.bf16.msra.mxu0 %v2238_v34  ;;  %2271 = vmatpush3.bf16.msra.mxu1 %v2270_v51 }
 0x104   : > { %2241 = vmatprep.subr.bf16.mxu0 %v2240_v8  ;;  %2273 = vmatprep.subr.bf16.mxu1 %v2272_v58 }
 0x107   : > { %2243 = vmatpush3.bf16.msra.mxu0 %v2242_v49  ;;  %2275 = vmatpush3.bf16.msra.mxu1 %v2274_v4 }
 0x194   : > { %v712_v13 = vpop.f32.mrb[0].mxu0  ;;  %v873_v16 = vpop.f32.mrb[0].mxu1 }
 0x195   : > { %v713_v44 = vadd.f32 %v712_v13, %v3208_v60  ;;  %v874_v17 = vadd.f32 %v873_v16, %v3210_v20  ;;  %v714_v19 = vpop.f32.mrb[1].mxu0  ;;  %v875_v21 = vpop.f32.mrb[1].mxu1 }
 0x196   : > { %v3219_v9 = vadd.f32 %v714_v19, %v3212_v53  ;;  %v3222_v50 = vadd.f32 %v875_v21, %v3214_v12 }
 0x197   : > { %v1032_v10 = vmul.f32 0.044715, %v713_v44  ;;  %v1034_v38 = vmul.f32 0.044715, %v874_v17  ;;  %v3252_v51 = vmul.f32 0.5, %v713_v44  ;;  %v3254_v57 = vmul.f32 0.5, %v874_v17 }
 0x198   : > { %v1033_v23 = vmul.f32 0.044715, %v3219_v9  ;;  %v1035_v54 = vmul.f32 0.044715, %v3222_v50  ;;  %v718_v24 = vpop.f32.mrb[2].mxu0  ;;  %v879_v30 = vpop.f32.mrb[2].mxu1 }
 0x199   : > { %v1096_v33 = vmul.f32 %v1032_v10, %v713_v44  ;;  %v1098_v6 = vmul.f32 %v1034_v38, %v874_v17  ;;  %v3227_v52 = vadd.f32 %v718_v24, %v3208_v60  ;;  %v3230_v11 = vadd.f32 %v879_v30, %v3210_v20  ;;  %v720_v45 = vpop.f32.mrb[3].mxu0  ;;  %v881_v29 = vpop.f32.mrb[3].mxu1 }
 0x19a   : > { %v1097_v18 = vmul.f32 %v1033_v23, %v3219_v9  ;;  %v3234_v59 = vadd.f32 %v720_v45, %v3212_v53  ;;  %v1099_v27 = vmul.f32 %v1035_v54, %v3222_v50  ;;  %v3238_v32 = vadd.f32 %v881_v29, %v3214_v12 }
 0x19b   : > { %v1160_v15 = vmul.f32 %v1096_v33, %v713_v44  ;;  %v1162_v25 = vmul.f32 %v1098_v6, %v874_v17  ;;  %v1036_v31 = vmul.f32 0.044715, %v3227_v52  ;;  %v1038_v3 = vmul.f32 0.044715, %v3230_v11 }
 0x19c   : > { %v724_v36 = vpop.f32.mrb[4].mxu0  ;;  %v885_v41 = vpop.f32.mrb[4].mxu1  ;;  %v1037_v55 = vmul.f32 0.044715, %v3234_v59  ;;  %v1039_v34 = vmul.f32 0.044715, %v3238_v32  ;;  %v1161_v2 = vmul.f32 %v1097_v18, %v3219_v9  ;;  %v1163_v0 = vmul.f32 %v1099_v27, %v3222_v50 }
 0x19d   : > { %v1224_v42 = vadd.f32 %v1160_v15, %v713_v44  ;;  %v726_v43 = vpop.f32.mrb[5].mxu0  ;;  %v887_v47 = vpop.f32.mrb[5].mxu1  ;;  %v1226_v48 = vadd.f32 %v1162_v25, %v874_v17  ;;  %v3244_v28 = vadd.f32 %v724_v36, %v3208_v60  ;;  %v3248_v56 = vadd.f32 %v885_v41, %v3210_v20 }
 0x19e   : > { %v3257_v46 = vadd.f32 %v726_v43, %v3212_v53  ;;  %v3260_v1 = vmul.f32 %v1036_v31, %v3227_v52  ;;  %v3263_v14 = vmul.f32 %v1038_v3, %v3230_v11  ;;  %v3266_v49 = vadd.f32 %v887_v47, %v3214_v12 }
 0x19f   : > { %v1288_v39 = vmul.f32 0.7978846, %v1224_v42  ;;  %v1290_v4 = vmul.f32 0.7978846, %v1226_v48  ;;  %v1101_v37 = vmul.f32 %v1037_v55, %v3234_v59  ;;  %v1040_v62 = vmul.f32 0.044715, %v3244_v28 }
 0x1a0   : > { %v730_v8 = vpop.f32.mrb[6].mxu0  ;;  %v891_v22 = vpop.f32.mrb[6].mxu1  ;;  %v3277_v40 = vmul.f32 %v1039_v34, %v3238_v32  ;;  %v1042_v5 = vmul.f32 0.044715, %v3248_v56  ;;  %v1225_v7 = vadd.f32 %v1161_v2, %v3219_v9  ;;  %v1227_v26 = vadd.f32 %v1163_v0, %v3222_v50 }
 0x1a1   : > { %v3269_v58 = vadd.f32 %v730_v8, %v3208_v60  ;;  %v732_v61 = vpop.f32.mrb[7].mxu0  ;;  %v893_v63 = vpop.f32.mrb[7].mxu1  ;;  %v3274_v35 = vadd.f32 %v891_v22, %v3210_v20  ;;  %2317 = vtanh.f32 %v1288_v39  ;;  %v1041_v13 = vmul.f32 0.044715, %v3257_v46 }
 0x1a2   : > { %v3284_v16 = vadd.f32 %v732_v61, %v3212_v53  ;;  %v3287_v44 = vadd.f32 %v893_v63, %v3214_v12  ;;  %v1043_v21 = vmul.f32 0.044715, %v3266_v49  ;;  %2319 = vtanh.f32 %v1290_v4 }
 0x1a3   : > { %v1044_v10 = vmul.f32 0.044715, %v3269_v58  ;;  %v3298_v30 = vmul.f32 %v1040_v62, %v3244_v28  ;;  %v1046_v33 = vmul.f32 0.044715, %v3274_v35  ;;  %v3305_v45 = vmul.f32 %v1042_v5, %v3248_v56 }
 0x1a4   : > { %v736_v17 = vpop.f32.mrb[8].mxu0  ;;  %v897_v19 = vpop.f32.mrb[8].mxu1  ;;  %v3308_v29 = vmul.f32 0.5, %v3219_v9  ;;  %v1289_v18 = vmul.f32 0.7978846, %v1225_v7  ;;  %v3311_v15 = vmul.f32 0.5, %v3222_v50  ;;  %v3314_v25 = vmul.f32 %v1041_v13, %v3257_v46 }
 0x1a5   : > { %v3292_v38 = vadd.f32 %v736_v17, %v3208_v60  ;;  %v3295_v23 = vadd.f32 %v897_v19, %v3210_v20  ;;  %v738_v54 = vpop.f32.mrb[9].mxu0  ;;  %v899_v24 = vpop.f32.mrb[9].mxu1  ;;  %v1045_v27 = vmul.f32 0.044715, %v3284_v16  ;;  %v1047_v36 = vmul.f32 0.044715, %v3287_v44 }
 0x1a6   : > { %v3302_v6 = vadd.f32 %v738_v54, %v3212_v53  ;;  %v3319_v41 = vadd.f32 %v899_v24, %v3214_v12  ;;  %v3322_v3 = vmul.f32 %v1043_v21, %v3266_v49  ;;  %v3325_v9 = vmul.f32 %v1044_v10, %v3269_v58 }
 0x1a7   : > { %4106 = vst [vmem:[#allocation2_spill] sm:$0xff] %v3292_v38  ;;  %4107 = vst [vmem:[#allocation3_spill] sm:$0xff] %v3295_v23  ;;  %v1048_v50 = vmul.f32 0.044715, %v3292_v38  ;;  %v1050_v43 = vmul.f32 0.044715, %v3295_v23  ;;  %v3330_v55 = vmul.f32 %v1046_v33, %v3274_v35  ;;  %2321 = vtanh.f32 %v1289_v18 }
 0x1a8   : > { %4108 = vst [vmem:[#allocation4_spill] sm:$0xff] %v3319_v41  ;;  %v742_v42 = vpop.f32.mrb[10].mxu0  ;;  %v903_v31 = vpop.f32.mrb[10].mxu1  ;;  %v1049_v34 = vmul.f32 0.044715, %v3302_v6  ;;  %v3346_v61 = vmul.f32 %v1045_v27, %v3284_v16  ;;  %v3349_v63 = vmul.f32 %v1047_v36, %v3287_v44  ;;  %v1165_v7 = vmul.f32 %v1101_v37, %v3234_v59 }
 0x1a9   : > { %v744_v47 = vpop.f32.mrb[11].mxu0  ;;  %v905_v48 = vpop.f32.mrb[11].mxu1  ;;  %v3334_v2 = vadd.f32 %v742_v42, %v3208_v60  ;;  %v3337_v0 = vadd.f32 %v903_v31, %v3210_v20  ;;  %v1291_v22 = vmul.f32 0.7978846, %v1227_v26  ;;  %v1051_v4 = vmul.f32 0.044715, %v3319_v41 }
 0x1aa   : > { %v3340_v39 = vadd.f32 %v744_v47, %v3212_v53  ;;  %v3343_v8 = vadd.f32 %v905_v48, %v3214_v12  ;;  %v3354_v13 = vmul.f32 %v1048_v50, %v3292_v38  ;;  %v3357_v17 = vmul.f32 %v1050_v43, %v3295_v23 }
 0x1ab   : > { %4109 = vst [vmem:[#allocation5_spill] sm:$0xff] %v3334_v2  ;;  %4110 = vst [vmem:[#allocation6_spill] sm:$0xff] %v3337_v0  ;;  %v2318_v54 = vpop.eup %2317  ;;  %v3366_v24 = vmul.f32 %v1049_v34, %v3302_v6  ;;  %v1052_v37 = vmul.f32 0.044715, %v3334_v2  ;;  %v1054_v27 = vmul.f32 0.044715, %v3337_v0  ;;  %2323 = vtanh.f32 %v1291_v22 }
 0x1ac   : > { %v748_v62 = vpop.f32.mrb[12].mxu0  ;;  %v909_v5 = vpop.f32.mrb[12].mxu1  ;;  %4111 = vst [vmem:[#allocation7_spill] sm:$0xff] %v3354_v13  ;;  %4112 = vst [vmem:[#allocation8_spill] sm:$0xff] %v3357_v17  ;;  %v1053_v36 = vmul.f32 0.044715, %v3340_v39  ;;  %v3379_v50 = vmul.f32 %v1051_v4, %v3319_v41  ;;  %v1164_v41 = vmul.f32 %v3260_v1, %v3227_v52 }
 0x1ad   : > { %v3360_v26 = vadd.f32 %v748_v62, %v3208_v60  ;;  %v3363_v19 = vadd.f32 %v909_v5, %v3210_v20  ;;  %v750_v21 = vpop.f32.mrb[13].mxu0  ;;  %v911_v10 = vpop.f32.mrb[13].mxu1  ;;  %v1055_v42 = vmul.f32 0.044715, %v3343_v8  ;;  %v1167_v62 = vmul.f32 %v3277_v40, %v3238_v32 }
 0x1ae   : > { %v3370_v33 = vadd.f32 %v750_v21, %v3212_v53  ;;  %v3373_v18 = vadd.f32 %v911_v10, %v3214_v12  ;;  %v2320_v31 = vpop.eup %2319  ;;  %4115 = vst [vmem:[#allocation11_spill] sm:$0xff] %v3379_v50  ;;  %v3394_v23 = vmul.f32 %v1052_v37, %v3334_v2  ;;  %v1416_v38 = vadd.f32 1.0, %v2318_v54 }
 0x1af   : > { %4113 = vst [vmem:[#allocation9_spill] sm:$0xff] %v3360_v26  ;;  %4114 = vst [vmem:[#allocation10_spill] sm:$0xff] %v3363_v19  ;;  %v1056_v43 = vmul.f32 0.044715, %v3360_v26  ;;  %v1058_v47 = vmul.f32 0.044715, %v3363_v19  ;;  %v1229_v40 = vadd.f32 %v1165_v7, %v3234_v59  ;;  %v3401_v50 = vmul.f32 %v1054_v27, %v3337_v0 }
 0x1b0   : > { %v754_v48 = vpop.f32.mrb[14].mxu0  ;;  %v915_v34 = vpop.f32.mrb[14].mxu1  ;;  %v1057_v5 = vmul.f32 0.044715, %v3370_v33  ;;  %v1059_v21 = vmul.f32 0.044715, %v3373_v18  ;;  %v3412_v37 = vmul.f32 %v1055_v42, %v3343_v8  ;;  %v1480_v2 = vmul.f32 %v1416_v38, %v3252_v51 }
 0x1b1   : > { %v3388_v10 = vadd.f32 %v754_v48, %v3208_v60  ;;  %v3391_v22 = vadd.f32 %v915_v34, %v3210_v20  ;;  %v756_v4 = vpop.f32.mrb[15].mxu0  ;;  %v917_v17 = vpop.f32.mrb[15].mxu1  ;;  %4118 = vst [vmem:[#allocation14_spill] sm:$0xff] %v3394_v23  ;;  %4119 = vst [vmem:[#allocation15_spill] sm:$0xff] %v3401_v50  ;;  %v3404_v48 = vmul.f32 %v1053_v36, %v3340_v39  ;;  %v1293_v51 = vmul.f32 0.7978846, %v1229_v40 }
 0x1b2   : > { %v3397_v13 = vadd.f32 %v756_v4, %v3212_v53  ;;  %v3407_v34 = vadd.f32 %v917_v17, %v3214_v12  ;;  %4120 = vst [vmem:[#allocation16_spill] sm:$0xff] %v3412_v37  ;;  %v3415_v4 = vmul.f32 %v1056_v43, %v3360_v26  ;;  %v1231_v50 = vadd.f32 %v1167_v62, %v3238_v32  ;;  %v2322_v36 = vpop.eup %2321 }
 0x1b3   : > { %4116 = vst [vmem:[#allocation12_spill] sm:$0xff] %v3388_v10  ;;  %4117 = vst [vmem:[#allocation13_spill] sm:$0xff] %v3391_v22  ;;  %v1060_v7 = vmul.f32 0.044715, %v3388_v10  ;;  %v3420_v0 = vmul.f32 %v1058_v47, %v3363_v19  ;;  %v3423_v17 = vmul.f32 %v1057_v5, %v3370_v33  ;;  %v3426_v1 = vmul.f32 %v1059_v21, %v3373_v18 }
 0x1b4   : > { %4121 = vst [vmem:[#allocation17_spill] sm:$0xff] %v3415_v4  ;;  %v760_v54 = vpop.f32.mrb[16].mxu0  ;;  %v921_v27 = vpop.f32.mrb[16].mxu1  ;;  %v1062_v42 = vmul.f32 0.044715, %v3391_v22  ;;  %v1417_v23 = vadd.f32 1.0, %v2322_v36  ;;  %v1228_v5 = vadd.f32 %v1164_v41, %v3227_v52  ;;  %v1166_v21 = vmul.f32 %v3263_v14, %v3230_v11 }
 0x1b5   : > { %4122 = vst [vmem:[#allocation18_spill] sm:$0xff] %v3420_v0  ;;  %4123 = vst [vmem:[#allocation19_spill] sm:$0xff] %v3426_v1  ;;  %v762_v43 = vpop.f32.mrb[17].mxu0  ;;  %v923_v4 = vpop.f32.mrb[17].mxu1  ;;  %v1061_v26 = vmul.f32 0.044715, %v3397_v13  ;;  %v3433_v47 = vadd.f32 %v760_v54, %v3208_v60  ;;  %v3439_v0 = vmul.f32 %v1060_v7, %v3388_v10  ;;  %v3443_v36 = vadd.f32 %v921_v27, %v3210_v20 }
 0x1b6   : > { %v1418_v62 = vadd.f32 1.0, %v2320_v31  ;;  %v1063_v37 = vmul.f32 0.044715, %v3407_v34  ;;  %v1481_v19 = vmul.f32 %v1417_v23, %v3308_v29  ;;  %v2324_v31 = vpop.eup %2323  ;;  %v3446_v1 = vmul.f32 %v1062_v42, %v3391_v22 }
 0x1b7   : > { %4124 = vst [vmem:[#allocation20_spill] sm:$0xff] %v3433_v47  ;;  %4125 = vst [vmem:[#allocation21_spill] sm:$0xff] %v3439_v0  ;;  %v3449_v54 = vadd.f32 %v762_v43, %v3212_v53  ;;  %v3452_v41 = vadd.f32 %v923_v4, %v3214_v12  ;;  %v1295_v14 = vmul.f32 0.7978846, %v1231_v50  ;;  %v3455_v7 = vmul.f32 %v1061_v26, %v3397_v13 }
 0x1b8   : > { %4126 = vst [vmem:[#allocation22_spill] sm:$0xff] %v3443_v36  ;;  %v766_v38 = vpop.f32.mrb[18].mxu0  ;;  %4127 = vst [vmem:[#allocation23_spill] sm:$0xff] %v3446_v1  ;;  %1676 = vmatprep.mubr.f32.mxu0 %v1481_v19  ;;  %v1419_v23 = vadd.f32 1.0, %v2324_v31  ;;  %v1482_v29 = vmul.f32 %v1418_v62, %v3254_v57  ;;  %2325 = vtanh.f32 %v1293_v51  ;;  %v927_v40 = vpop.f32.mrb[18].mxu1  ;;  %v3460_v43 = vmul.f32 0.5, %v3234_v59 }
 0x1b9   : > { %4128 = vst [vmem:[#allocation24_spill] sm:$0xff] %v3449_v54  ;;  %4129 = vst [vmem:[#allocation25_spill] sm:$0xff] %v3452_v41  ;;  %v768_v27 = vpop.f32.mrb[19].mxu0  ;;  %1677 = vmatmul.mubr.f32.vlgmr.msra.gmra.mrb[32].mxu0 %v1480_v2  ;;  %v1064_v42 = vmul.f32 0.044715, %v3433_v47  ;;  %2327 = vtanh.f32 %v1295_v14  ;;  %v929_v1 = vpop.f32.mrb[19].mxu1  ;;  %v1230_v19 = vadd.f32 %v1166_v21, %v3230_v11  ;;  %v3466_v57 = vadd.f32 %v766_v38, %v3208_v60 }
 0x1ba   : > { %v1292_v4 = vmul.f32 0.7978846, %v1228_v5  ;;  %v1483_v50 = vmul.f32 %v1419_v23, %v3311_v15  ;;  %v1066_v26 = vmul.f32 0.044715, %v3443_v36  ;;  %v3471_v2 = vmul.f32 %v1063_v37, %v3407_v34 }
 0x1bb   : > { %4130 = vst [vmem:[#allocation26_spill] sm:$0xff] %v3466_v57  ;;  %v1065_v59 = vmul.f32 0.044715, %v3449_v54  ;;  %v1067_v5 = vmul.f32 0.044715, %v3452_v41  ;;  %v3480_v38 = vadd.f32 %v927_v40, %v3210_v20  ;;  %v3483_v14 = vadd.f32 %v768_v27, %v3212_v53 }
 0x1bc   : > { %v772_v62 = vpop.f32.mrb[20].mxu0  ;;  %v3468_v51 = vpop.f32.mrb[20].mxu1  ;;  %4131 = vst [vmem:[#allocation27_spill] sm:$0xff] %v3471_v2  ;;  %2329 = vtanh.f32 %v1292_v4  ;;  %1821 = vmatprep.mubr.f32.mxu1 %v1483_v50  ;;  %v1294_v21 = vmul.f32 0.7978846, %v1230_v19  ;;  %v1169_v37 = vmul.f32 %v3314_v25, %v3257_v46  ;;  %v3488_v23 = vmul.f32 %v1064_v42, %v3433_v47 }
 0x1bd   : > { %v3475_v31 = vpop.f32.mrb[21].mxu0  ;;  %v3477_v15 = vpop.f32.mrb[21].mxu1  ;;  %4132 = vst [vmem:[#allocation28_spill] sm:$0xff] %v3480_v38  ;;  %1822 = vmatmul.mubr.f32.vlgmr.msra.gmra.mrb[32].mxu1 %v1482_v29  ;;  %v975_v4 = vmul.f32 0.5, %v3238_v32  ;;  %v3492_v22 = vadd.f32 %v929_v1, %v3214_v12  ;;  %v1171_v50 = vmul.f32 %v3322_v3, %v3266_v49  ;;  %v3497_v40 = vmul.f32 %v1066_v26, %v3443_v36 }
 0x1be   : > { %4133 = vst [vmem:[#allocation29_spill] sm:$0xff] %v3488_v23  ;;  %2331 = vtanh.f32 %v1294_v21  ;;  %v1068_v27 = vmul.f32 0.044715, %v3466_v57  ;;  %v1233_v25 = vadd.f32 %v1169_v37, %v3257_v46  ;;  %v3506_v32 = vmul.f32 %v1065_v59, %v3449_v54 }
 0x1bf   : > { %4134 = vst [vmem:[#allocation30_spill] sm:$0xff] %v3492_v22  ;;  %4135 = vst [vmem:[#allocation31_spill] sm:$0xff] %v3497_v40  ;;  %v3509_v1 = vmul.f32 %v1067_v5, %v3452_v41  ;;  %v972_v3 = vmul.f32 0.5, %v3227_v52  ;;  %v1235_v26 = vadd.f32 %v1171_v50, %v3266_v49  ;;  %v1070_v37 = vmul.f32 0.044715, %v3480_v38 }
 0x1c0   : > { %v3501_v29 = vpop.f32.mrb[22].mxu0  ;;  %v3503_v42 = vpop.f32.mrb[22].mxu1  ;;  %4136 = vst [vmem:[#allocation32_spill] sm:$0xff] %v3506_v32  ;;  %v1069_v40 = vmul.f32 0.044715, %v3483_v14  ;;  %v1168_v59 = vmul.f32 %v3298_v30, %v3244_v28  ;;  %v974_v23 = vmul.f32 0.5, %v3230_v11  ;;  %v1170_v52 = vmul.f32 %v3305_v45, %v3248_v56 }
 0x1c1   : > { %4137 = vst [vmem:[#allocation33_spill] sm:$0xff] %v3509_v1  ;;  %v3513_v19 = vpop.f32.mrb[23].mxu0  ;;  %v3515_v21 = vpop.f32.mrb[23].mxu1  ;;  %v1297_v36 = vmul.f32 0.7978846, %v1233_v25  ;;  %v3526_v1 = vmul.f32 %v1068_v27, %v3466_v57  ;;  %v3529_v41 = vmul.f32 0.5, %v3257_v46 }
 0x1c2   : > { %v1071_v5 = vmul.f32 0.044715, %v3492_v22  ;;  %v1299_v47 = vmul.f32 0.7978846, %v1235_v26  ;;  %v2326_v50 = vpop.eup %2325  ;;  %v1232_v25 = vadd.f32 %v1168_v59, %v3244_v28  ;;  %v3537_v26 = vmul.f32 0.5, %v3266_v49 }
 0x1c3   : > { %4138 = vst [vmem:[#allocation34_spill] sm:$0xff] %v3526_v1  ;;  %2333 = vtanh.f32 %v1297_v36  ;;  %v2328_v11 = vpop.eup %2327  ;;  %v1421_v54 = vadd.f32 1.0, %v2326_v50  ;;  %v1234_v45 = vadd.f32 %v1170_v52, %v3248_v56  ;;  %v3545_v36 = vmul.f32 %v1070_v37, %v3480_v38 }
 0x1c4   : > { %v3532_v32 = vpop.f32.mrb[24].mxu0  ;;  %v3534_v30 = vpop.f32.mrb[24].mxu1  ;;  %2335 = vtanh.f32 %v1299_v47  ;;  %v1423_v46 = vadd.f32 1.0, %v2328_v11  ;;  %v3548_v59 = vmul.f32 %v1069_v40, %v3483_v14  ;;  %v1296_v57 = vmul.f32 0.7978846, %v1232_v25 }
 0x1c5   : > { %v3540_v27 = vpop.f32.mrb[25].mxu0  ;;  %v3542_v1 = vpop.f32.mrb[25].mxu1  ;;  %4139 = vst [vmem:[#allocation35_spill] sm:$0xff] %v3545_v36  ;;  %v1485_v50 = vmul.f32 %v1421_v54, %v3460_v43  ;;  %v3552_v49 = vmul.f32 %v1071_v5, %v3492_v22  ;;  %v1298_v47 = vmul.f32 0.7978846, %v1234_v45  ;;  %v3555_v52 = vadd.f32 %v772_v62, %v3208_v60 }
 0x1c6   : > { %4140 = vst [vmem:[#allocation36_spill] sm:$0xff] %v3548_v59  ;;  %v2330_v0 = vpop.eup %2329  ;;  %v1487_v10 = vmul.f32 %v1423_v46, %v975_v4  ;;  %2337 = vtanh.f32 %v1296_v57  ;;  %v3559_v37 = vadd.f32 %v3468_v51, %v3210_v20  ;;  %v3566_v54 = vmul.f32 0.5, %v3244_v28 }
 0x1c7   : > { %4141 = vst [vmem:[#allocation37_spill] sm:$0xff] %v3552_v49  ;;  %4142 = vst [vmem:[#allocation38_spill] sm:$0xff] %v3555_v52  ;;  %v1420_v2 = vadd.f32 1.0, %v2330_v0  ;;  %1681 = vmatprep.mubr.f32.mxu0 %v1485_v50  ;;  %2339 = vtanh.f32 %v1298_v47  ;;  %v3570_v43 = vadd.f32 %v3475_v31, %v3212_v53  ;;  %v1173_v0 = vmul.f32 %v3346_v61, %v3284_v16 }
 0x1c8   : > { %4143 = vst [vmem:[#allocation39_spill] sm:$0xff] %v3559_v37  ;;  %v3561_v40 = vpop.f32.mrb[26].mxu0  ;;  %v3563_v25 = vpop.f32.mrb[26].mxu1  ;;  %1826 = vmatprep.mubr.f32.mxu1 %v1487_v10  ;;  %v3579_v5 = vmul.f32 0.5, %v3248_v56  ;;  %v3583_v28 = vadd.f32 %v3477_v15, %v3214_v12  ;;  %v1175_v31 = vmul.f32 %v3349_v63, %v3287_v44  ;;  %v1072_v61 = vmul.f32 0.044715, %v3555_v52 }
 0x1c9   : > { %v3574_v57 = vpop.f32.mrb[27].mxu0  ;;  %v3576_v62 = vpop.f32.mrb[27].mxu1  ;;  %v1484_v4 = vmul.f32 %v1420_v2, %v972_v3  ;;  %v1237_v45 = vadd.f32 %v1173_v0, %v3284_v16  ;;  %v1172_v46 = vmul.f32 %v3325_v9, %v3269_v58  ;;  %v1074_v10 = vmul.f32 0.044715, %v3559_v37 }
 0x1ca   : > { %v2332_v51 = vpop.eup %2331  ;;  %v3593_v56 = vmul.f32 0.5, %v3284_v16  ;;  %v1239_v2 = vadd.f32 %v1175_v31, %v3287_v44  ;;  %v1174_v15 = vmul.f32 %v3330_v55, %v3274_v35  ;;  %v1073_v47 = vmul.f32 0.044715, %v3570_v43 }
 0x1cb   : > { %v1422_v11 = vadd.f32 1.0, %v2332_v51  ;;  %1682 = vmatmul.mubr.f32.gmra.mrb[34].mxu0 %v1484_v4  ;;  %v1301_v0 = vmul.f32 0.7978846, %v1237_v45  ;;  %v1236_v9 = vadd.f32 %v1172_v46, %v3269_v58  ;;  %v1075_v31 = vmul.f32 0.044715, %v3583_v28 }
 0x1cc   : > { %v3598_v63 = vpop.f32.mrb[28].mxu0  ;;  %v3600_v3 = vpop.f32.mrb[28].mxu1  ;;  %v1303_v36 = vmul.f32 0.7978846, %v1239_v2  ;;  %v1238_v55 = vadd.f32 %v1174_v15, %v3274_v35  ;;  %v3612_v38 = vadd.f32 %v3501_v29, %v3208_v60  ;;  %v3616_v46 = vadd.f32 %v3503_v42, %v3210_v20 }
 0x1cd   : > { %v1486_v50 = vmul.f32 %v1422_v11, %v974_v23  ;;  %v3604_v51 = vpop.f32.mrb[29].mxu0  ;;  %v3606_v4 = vpop.f32.mrb[29].mxu1  ;;  %2341 = vtanh.f32 %v1301_v0  ;;  %v1300_v45 = vmul.f32 0.7978846, %v1236_v9  ;;  %v3619_v22 = vmul.f32 %v1072_v61, %v3555_v52 }
 0x1ce   : > { %v2334_v16 = vpop.eup %2333  ;;  %2343 = vtanh.f32 %v1303_v36  ;;  %v1302_v2 = vmul.f32 0.7978846, %v1238_v55  ;;  %v3630_v0 = vmul.f32 %v1073_v47, %v3570_v43  ;;  %v1076_v47 = vmul.f32 0.044715, %v3612_v38 }
 0x1cf   : > { %v2336_v23 = vpop.eup %2335  ;;  %1827 = vmatmul.mubr.f32.gmra.mrb[34].mxu1 %v1486_v50  ;;  %v1425_v11 = vadd.f32 1.0, %v2334_v16  ;;  %4144 = vst [vmem:[#allocation40_spill] sm:$0xff] %v3619_v22  ;;  %v3627_v50 = vmul.f32 %v1074_v10, %v3559_v37  ;;  %2345 = vtanh.f32 %v1300_v45  ;;  %v983_v16 = vmul.f32 0.5, %v3287_v44  ;;  %v4149_v37 = vld [vmem:[#allocation2_spill] sm:$0xff]  ;;  %v4150_v22 = vld [vmem:[#allocation7_spill] sm:$0xff] }
 0x1d0   : > { %v1427_v49 = vadd.f32 1.0, %v2336_v23  ;;  %v3621_v15 = vpop.f32.mrb[30].mxu0  ;;  %v3623_v59 = vpop.f32.mrb[30].mxu1  ;;  %2347 = vtanh.f32 %v1302_v2  ;;  %v1078_v23 = vmul.f32 0.044715, %v3616_v46  ;;  %v980_v44 = vmul.f32 0.5, %v3269_v58 }
 0x1d1   : > { %v1489_v29 = vmul.f32 %v1425_v11, %v3529_v41  ;;  %4145 = vst [vmem:[#allocation41_spill] sm:$0xff] %v3627_v50  ;;  %v3632_v42 = vpop.f32.mrb[31].mxu0  ;;  %v3634_v9 = vpop.f32.mrb[31].mxu1  ;;  %v3640_v41 = vadd.f32 %v3513_v19, %v3212_v53  ;;  %v1177_v11 = vmul.f32 %v3366_v24, %v3302_v6  ;;  %v4148_v19 = vld [vmem:[#allocation11_spill] sm:$0xff]  ;;  %v1176_v52 = vmul.f32 %v4150_v22, %v4149_v37  ;;  %v4152_v58 = vld [vmem:[#allocation8_spill] sm:$0xff] }
 0x1d2   : > { %v2338_v61 = vpop.eup %2337  ;;  %v1491_v36 = vmul.f32 %v1427_v49, %v3537_v26  ;;  %v3647_v26 = vmul.f32 %v1075_v31, %v3583_v28  ;;  %v4147_v49 = vld [vmem:[#allocation4_spill] sm:$0xff]  ;;  %v3671_v22 = vadd.f32 %v3515_v21, %v3214_v12 }
 0x1d3   : > { %v2340_v10 = vpop.eup %2339  ;;  %1686 = vmatprep.mubr.f32.mxu0 %v1489_v29  ;;  %v1424_v55 = vadd.f32 1.0, %v2338_v61  ;;  %v1179_v2 = vmul.f32 %v4148_v19, %v4147_v49  ;;  %v982_v61 = vmul.f32 0.5, %v3274_v35  ;;  %v1241_v50 = vadd.f32 %v1177_v11, %v3302_v6 }
 0x1d4   : > { %1831 = vmatprep.mubr.f32.mxu1 %v1491_v36  ;;  %v1426_v45 = vadd.f32 1.0, %v2340_v10  ;;  %4146 = vst [vmem:[#allocation42_spill] sm:$0xff] %v3647_v26  ;;  %v1077_v36 = vmul.f32 0.044715, %v3640_v41  ;;  %v4151_v10 = vld [vmem:[#allocation3_spill] sm:$0xff]  ;;  %v3663_v19 = vmul.f32 %v1076_v47, %v3612_v38  ;;  %v3666_v35 = vmul.f32 %v1078_v23, %v3616_v46 }
 0x1d5   : > { %v1488_v29 = vmul.f32 %v1424_v55, %v3566_v54  ;;  %v1243_v31 = vadd.f32 %v1179_v2, %v4147_v49  ;;  %v1178_v26 = vmul.f32 %v4152_v58, %v4151_v10  ;;  %v1305_v54 = vmul.f32 0.7978846, %v1241_v50 }
 0x1d6   : > { %v1490_v24 = vmul.f32 %v1426_v45, %v3579_v5  ;;  %v1240_v55 = vadd.f32 %v1176_v52, %v4149_v37  ;;  %v3674_v5 = vmul.f32 0.5, %v3302_v6  ;;  %v3679_v23 = vadd.f32 %v3532_v32, %v3208_v60 }
 0x1d7   : > { %1687 = vmatmul.mubr.f32.gmra.mrb[36].mxu0 %v1488_v29  ;;  %v1307_v11 = vmul.f32 0.7978846, %v1243_v31  ;;  %v1242_v45 = vadd.f32 %v1178_v26, %v4151_v10  ;;  %v2342_v2 = vpop.eup %2341  ;;  %2349 = vtanh.f32 %v1305_v54  ;;  %v3683_v52 = vadd.f32 %v3534_v30, %v3210_v20 }
 0x1d8   : > { %1832 = vmatmul.mubr.f32.gmra.mrb[36].mxu1 %v1490_v24  ;;  %v1304_v47 = vmul.f32 0.7978846, %v1240_v55  ;;  %v2344_v50 = vpop.eup %2343  ;;  %v1429_v21 = vadd.f32 1.0, %v2342_v2  ;;  %v3686_v29 = vmul.f32 %v1077_v36, %v3640_v41  ;;  %v987_v31 = vmul.f32 0.5, %v4147_v49 }
 0x1d9   : > { %4153 = vst [vmem:[#allocation4_spill] sm:$0xff] %v3683_v52  ;;  %2351 = vtanh.f32 %v1307_v11  ;;  %v1306_v6 = vmul.f32 0.7978846, %v1242_v45  ;;  %v2346_v24 = vpop.eup %2345  ;;  %v1431_v26 = vadd.f32 1.0, %v2344_v50  ;;  %v3691_v32 = vadd.f32 %v3540_v27, %v3212_v53  ;;  %v4154_v50 = vld [vmem:[#allocation16_spill] sm:$0xff] }
 0x1da   : > { %2353 = vtanh.f32 %v1304_v47  ;;  %v2348_v58 = vpop.eup %2347  ;;  %v1493_v30 = vmul.f32 %v1429_v21, %v3593_v56  ;;  %v1428_v54 = vadd.f32 1.0, %v2346_v24  ;;  %v1079_v55 = vmul.f32 0.044715, %v3671_v22  ;;  %v4155_v24 = vld [vmem:[#allocation5_spill] sm:$0xff] }
 0x1db   : > { %2355 = vtanh.f32 %v1306_v6  ;;  %v1495_v36 = vmul.f32 %v1431_v26, %v983_v16  ;;  %v1430_v2 = vadd.f32 1.0, %v2348_v58  ;;  %v1080_v11 = vmul.f32 0.044715, %v3679_v23  ;;  %v4156_v26 = vld [vmem:[#allocation14_spill] sm:$0xff] }
 0x1dc   : > { %v1082_v45 = vmul.f32 0.044715, %v3683_v52  ;;  %1691 = vmatprep.mubr.f32.mxu0 %v1493_v30  ;;  %v1492_v49 = vmul.f32 %v1428_v54, %v980_v44  ;;  %v984_v47 = vmul.f32 0.5, %v4149_v37  ;;  %v1181_v27 = vmul.f32 %v3404_v48, %v3340_v39  ;;  %v4157_v30 = vld [vmem:[#allocation6_spill] sm:$0xff]  ;;  %v4158_v54 = vld [vmem:[#allocation15_spill] sm:$0xff] }
 0x1dd   : > { %v1183_v56 = vmul.f32 %v4154_v50, %v3343_v8  ;;  %1836 = vmatprep.mubr.f32.mxu1 %v1495_v36  ;;  %v1494_v21 = vmul.f32 %v1430_v2, %v982_v61  ;;  %v986_v6 = vmul.f32 0.5, %v4151_v10  ;;  %v1081_v16 = vmul.f32 0.044715, %v3691_v32 }
 0x1de   : > { %v1180_v58 = vmul.f32 %v4156_v26, %v4155_v24  ;;  %1692 = vmatmul.mubr.f32.gmra.mrb[38].mxu0 %v1492_v49  ;;  %v3707_v44 = vmul.f32 %v1079_v55, %v3671_v22  ;;  %v1245_v37 = vadd.f32 %v1181_v27, %v3340_v39  ;;  %v1182_v50 = vmul.f32 %v4158_v54, %v4157_v30 }
 0x1df   : > { %v1247_v48 = vadd.f32 %v1183_v56, %v3343_v8  ;;  %1837 = vmatmul.mubr.f32.gmra.mrb[38].mxu1 %v1494_v21  ;;  %v3714_v61 = vmul.f32 %v1080_v11, %v3679_v23  ;;  %v3717_v10 = vmul.f32 %v1082_v45, %v3683_v52  ;;  %v3721_v36 = vadd.f32 %v3542_v1, %v3214_v12 }
 0x1e0   : > { %v1244_v55 = vadd.f32 %v1180_v58, %v4155_v24  ;;  %v1309_v2 = vmul.f32 0.7978846, %v1245_v37  ;;  %v1246_v27 = vadd.f32 %v1182_v50, %v4157_v30  ;;  %v3727_v56 = vadd.f32 %v3561_v40, %v3208_v60 }
 0x1e1   : > { %4159 = vst [vmem:[#allocation11_spill] sm:$0xff] %v3714_v61  ;;  %4160 = vst [vmem:[#allocation2_spill] sm:$0xff] %v3717_v10  ;;  %v1311_v49 = vmul.f32 0.7978846, %v1247_v48  ;;  %v2350_v21 = vpop.eup %2349  ;;  %v3730_v11 = vmul.f32 %v1081_v16, %v3691_v32  ;;  %v3734_v26 = vadd.f32 %v3563_v25, %v3210_v20  ;;  %v3738_v1 = vadd.f32 %v3574_v57, %v3212_v53 }
 0x1e2   : > { %v1308_v45 = vmul.f32 0.7978846, %v1244_v55  ;;  %v1433_v37 = vadd.f32 1.0, %v2350_v21  ;;  %2357 = vtanh.f32 %v1309_v2  ;;  %v1310_v48 = vmul.f32 0.7978846, %v1246_v27 }
 0x1e3   : > { %4161 = vst [vmem:[#allocation7_spill] sm:$0xff] %v3734_v26  ;;  %v2352_v58 = vpop.eup %2351  ;;  %v1185_v40 = vmul.f32 %v3423_v17, %v3370_v33  ;;  %v1083_v16 = vmul.f32 0.044715, %v3721_v36  ;;  %v989_v55 = vmul.f32 0.5, %v3340_v39  ;;  %2359 = vtanh.f32 %v1311_v49 }
 0x1e4   : > { %v2354_v54 = vpop.eup %2353  ;;  %v1435_v50 = vadd.f32 1.0, %v2352_v58  ;;  %v1497_v10 = vmul.f32 %v1433_v37, %v3674_v5  ;;  %2361 = vtanh.f32 %v1308_v45  ;;  %v1084_v57 = vmul.f32 0.044715, %v3727_v56  ;;  %v4162_v45 = vld [vmem:[#allocation19_spill] sm:$0xff] }
 0x1e5   : > { %v2356_v25 = vpop.eup %2355  ;;  %v1432_v52 = vadd.f32 1.0, %v2354_v54  ;;  %2363 = vtanh.f32 %v1310_v48  ;;  %v1086_v27 = vmul.f32 0.044715, %v3734_v26  ;;  %v991_v58 = vmul.f32 0.5, %v3343_v8  ;;  %v4166_v54 = vld [vmem:[#allocation18_spill] sm:$0xff] }
 0x1e6   : > { %v1499_v21 = vmul.f32 %v1435_v50, %v987_v31  ;;  %v1434_v2 = vadd.f32 1.0, %v2356_v25  ;;  %1696 = vmatprep.mubr.f32.mxu0 %v1497_v10  ;;  %v1085_v61 = vmul.f32 0.044715, %v3738_v1  ;;  %v1249_v39 = vadd.f32 %v1185_v40, %v3370_v33  ;;  %v4164_v10 = vld [vmem:[#allocation17_spill] sm:$0xff]  ;;  %v4165_v40 = vld [vmem:[#allocation10_spill] sm:$0xff] }
 0x1e7   : > { %v1496_v17 = vmul.f32 %v1432_v52, %v984_v47  ;;  %v3751_v5 = vmul.f32 %v1083_v16, %v3721_v36  ;;  %v3755_v31 = vadd.f32 %v3576_v62, %v3214_v12  ;;  %v1187_v37 = vmul.f32 %v4162_v45, %v3373_v18  ;;  %v4163_v47 = vld [vmem:[#allocation9_spill] sm:$0xff] }
 0x1e8   : > { %1841 = vmatprep.mubr.f32.mxu1 %v1499_v21  ;;  %v1498_v49 = vmul.f32 %v1434_v2, %v986_v6  ;;  %v988_v52 = vmul.f32 0.5, %v4155_v24  ;;  %v1313_v8 = vmul.f32 0.7978846, %v1249_v39  ;;  %v1184_v48 = vmul.f32 %v4164_v10, %v4163_v47 }
 0x1e9   : > { %1697 = vmatmul.mubr.f32.gmra.mrb[40].mxu0 %v1496_v17  ;;  %v1186_v6 = vmul.f32 %v4166_v54, %v4165_v40  ;;  %v990_v50 = vmul.f32 0.5, %v4157_v30  ;;  %v3766_v16 = vmul.f32 %v1084_v57, %v3727_v56  ;;  %v3769_v62 = vmul.f32 %v1086_v27, %v3734_v26 }
 0x1ea   : > { %1842 = vmatmul.mubr.f32.gmra.mrb[40].mxu1 %v1498_v49  ;;  %v1251_v25 = vadd.f32 %v1187_v37, %v3373_v18  ;;  %v3773_v24 = vmul.f32 %v1085_v61, %v3738_v1  ;;  %2365 = vtanh.f32 %v1313_v8  ;;  %v1248_v21 = vadd.f32 %v1184_v48, %v4163_v47 }
 0x1eb   : > { %4167 = vst [vmem:[#allocation3_spill] sm:$0xff] %v3769_v62  ;;  %v1250_v2 = vadd.f32 %v1186_v6, %v4165_v40  ;;  %v1087_v17 = vmul.f32 0.044715, %v3755_v31  ;;  %v993_v30 = vmul.f32 0.5, %v3370_v33  ;;  %v3781_v57 = vadd.f32 %v3598_v63, %v3208_v60  ;;  %v4169_v63 = vld [vmem:[#allocation27_spill] sm:$0xff] }
 0x1ec   : > { %v1315_v39 = vmul.f32 0.7978846, %v1251_v25  ;;  %v2358_v27 = vpop.eup %2357  ;;  %v1312_v49 = vmul.f32 0.7978846, %v1248_v21  ;;  %v3785_v61 = vadd.f32 %v3600_v3, %v3210_v20  ;;  %v1189_v37 = vmul.f32 %v3455_v7, %v3397_v13 }
 0x1ed   : > { %v1314_v45 = vmul.f32 0.7978846, %v1250_v2  ;;  %v2360_v8 = vpop.eup %2359  ;;  %v1437_v10 = vadd.f32 1.0, %v2358_v27  ;;  %v3791_v33 = vadd.f32 %v3604_v51, %v3212_v53  ;;  %v1191_v48 = vmul.f32 %v4169_v63, %v3407_v34 }
 0x1ee   : > { %4168 = vst [vmem:[#allocation8_spill] sm:$0xff] %v3785_v61  ;;  %2367 = vtanh.f32 %v1315_v39  ;;  %v2362_v54 = vpop.eup %2361  ;;  %v1439_v6 = vadd.f32 1.0, %v2360_v8  ;;  %v995_v25 = vmul.f32 0.5, %v3373_v18  ;;  %v3798_v3 = vadd.f32 %v3606_v4, %v3214_v12 }
 0x1ef   : > { %2369 = vtanh.f32 %v1312_v49  ;;  %v2364_v7 = vpop.eup %2363  ;;  %v1501_v21 = vmul.f32 %v1437_v10, %v989_v55  ;;  %v1436_v2 = vadd.f32 1.0, %v2362_v54  ;;  %v1088_v39 = vmul.f32 0.044715, %v3781_v57  ;;  %v4171_v54 = vld [vmem:[#allocation21_spill] sm:$0xff] }
 0x1f0   : > { %2371 = vtanh.f32 %v1314_v45  ;;  %v1503_v51 = vmul.f32 %v1439_v6, %v991_v58  ;;  %v1438_v27 = vadd.f32 1.0, %v2364_v7  ;;  %v1090_v62 = vmul.f32 0.044715, %v3785_v61  ;;  %v4170_v58 = vld [vmem:[#allocation12_spill] sm:$0xff] }
 0x1f1   : > { %v1253_v63 = vadd.f32 %v1189_v37, %v3397_v13  ;;  %1701 = vmatprep.mubr.f32.mxu0 %v1501_v21  ;;  %v1500_v8 = vmul.f32 %v1436_v2, %v988_v52  ;;  %v3804_v18 = vmul.f32 %v1087_v17, %v3755_v31  ;;  %v1089_v4 = vmul.f32 0.044715, %v3791_v33  ;;  %v4172_v17 = vld [vmem:[#allocation13_spill] sm:$0xff]  ;;  %v4173_v21 = vld [vmem:[#allocation23_spill] sm:$0xff] }
 0x1f2   : > { %v1255_v49 = vadd.f32 %v1191_v48, %v3407_v34  ;;  %1846 = vmatprep.mubr.f32.mxu1 %v1503_v51  ;;  %v1502_v55 = vmul.f32 %v1438_v27, %v990_v50  ;;  %v992_v45 = vmul.f32 0.5, %v4163_v47  ;;  %v1188_v6 = vmul.f32 %v4171_v54, %v4170_v58 }
 0x1f3   : > { %v1317_v10 = vmul.f32 0.7978846, %v1253_v63  ;;  %1702 = vmatmul.mubr.f32.gmra.mrb[42].mxu0 %v1500_v8  ;;  %v994_v37 = vmul.f32 0.5, %v4165_v40  ;;  %v1091_v52 = vmul.f32 0.044715, %v3798_v3  ;;  %v1190_v2 = vmul.f32 %v4173_v21, %v4172_v17 }
 0x1f4   : > { %v1319_v7 = vmul.f32 0.7978846, %v1255_v49  ;;  %v2366_v26 = vpop.eup %2365  ;;  %1847 = vmatmul.mubr.f32.gmra.mrb[42].mxu1 %v1502_v55  ;;  %v3816_v48 = vmul.f32 %v1088_v39, %v3781_v57  ;;  %v3819_v47 = vmul.f32 %v1090_v62, %v3785_v61  ;;  %v1252_v50 = vadd.f32 %v1188_v6, %v4170_v58  ;;  %v4176_v49 = vld [vmem:[#allocation24_spill] sm:$0xff] }
 0x1f5   : > { %2373 = vtanh.f32 %v1317_v10  ;;  %v1441_v51 = vadd.f32 1.0, %v2366_v26  ;;  %v3823_v40 = vmul.f32 %v1089_v4, %v3791_v33  ;;  %v1254_v27 = vadd.f32 %v1190_v2, %v4172_v17  ;;  %v4177_v62 = vld [vmem:[#allocation32_spill] sm:$0xff] }
 0x1f6   : > { %4174 = vst [vmem:[#allocation16_spill] sm:$0xff] %v3819_v47  ;;  %2375 = vtanh.f32 %v1319_v7  ;;  %v997_v63 = vmul.f32 0.5, %v3397_v13  ;;  %v1316_v8 = vmul.f32 0.7978846, %v1252_v50  ;;  %v3829_v39 = vadd.f32 %v3621_v15, %v3208_v60 }
 0x1f7   : > { %v1193_v55 = vmul.f32 %v4177_v62, %v4176_v49  ;;  %v1505_v54 = vmul.f32 %v1441_v51, %v993_v30  ;;  %v3834_v26 = vmul.f32 %v1091_v52, %v3798_v3  ;;  %v999_v4 = vmul.f32 0.5, %v3407_v34 }
 0x1f8   : > { %4175 = vst [vmem:[#allocation5_spill] sm:$0xff] %v3829_v39  ;;  %v2368_v10 = vpop.eup %2367  ;;  %v1318_v6 = vmul.f32 0.7978846, %v1254_v27  ;;  %v996_v13 = vmul.f32 0.5, %v4170_v58  ;;  %2377 = vtanh.f32 %v1316_v8  ;;  %v3840_v60 = vadd.f32 %v3623_v59, %v3210_v20  ;;  %v4178_v59 = vld [vmem:[#allocation25_spill] sm:$0xff] }
 0x1f9   : > { %v2370_v7 = vpop.eup %2369  ;;  %v1443_v21 = vadd.f32 1.0, %v2368_v10  ;;  %1706 = vmatprep.mubr.f32.mxu0 %v1505_v54  ;;  %v998_v30 = vmul.f32 0.5, %v4172_v17  ;;  %v3845_v52 = vadd.f32 %v3632_v42, %v3212_v53  ;;  %v1092_v51 = vmul.f32 0.044715, %v3829_v39  ;;  %v4179_v8 = vld [vmem:[#allocation33_spill] sm:$0xff]  ;;  %v4180_v17 = vld [vmem:[#allocation20_spill] sm:$0xff] }
 0x1fa   : > { %v2372_v15 = vpop.eup %2371  ;;  %v1440_v2 = vadd.f32 1.0, %v2370_v7  ;;  %2379 = vtanh.f32 %v1318_v6  ;;  %v1257_v58 = vadd.f32 %v1193_v55, %v4176_v49  ;;  %v3851_v20 = vadd.f32 %v3634_v9, %v3214_v12  ;;  %v4181_v10 = vld [vmem:[#allocation29_spill] sm:$0xff]  ;;  %v4183_v6 = vld [vmem:[#allocation22_spill] sm:$0xff]  ;;  %v4184_v7 = vld [vmem:[#allocation31_spill] sm:$0xff] }
 0x1fb   : > { %v1507_v34 = vmul.f32 %v1443_v21, %v995_v25  ;;  %v1442_v50 = vadd.f32 1.0, %v2372_v15  ;;  %v1195_v62 = vmul.f32 %v4179_v8, %v4178_v59  ;;  %v1192_v54 = vmul.f32 %v4181_v10, %v4180_v17  ;;  %v4185_v21 = vld [vmem:[#allocation36_spill] sm:$0xff] }
 0x1fc   : > { %v1504_v27 = vmul.f32 %v1440_v2, %v992_v45  ;;  %v3858_v42 = vmul.f32 0.044715, %v3840_v60  ;;  %v1321_v25 = vmul.f32 0.7978846, %v1257_v58  ;;  %v1194_v55 = vmul.f32 %v4184_v7, %v4183_v6  ;;  %v4188_v58 = vld [vmem:[#allocation37_spill] sm:$0xff] }
 0x1fd   : > { %1851 = vmatprep.mubr.f32.mxu1 %v1507_v34  ;;  %v1506_v53 = vmul.f32 %v1442_v50, %v994_v37  ;;  %v1093_v45 = vmul.f32 0.044715, %v3845_v52  ;;  %v1259_v12 = vadd.f32 %v1195_v62, %v4178_v59  ;;  %v1256_v9 = vadd.f32 %v1192_v54, %v4180_v17  ;;  %v4187_v50 = vld [vmem:[#allocation30_spill] sm:$0xff] }
 0x1fe   : > { %4182 = vst [vmem:[#allocation14_spill] sm:$0xff] %v3858_v42  ;;  %1707 = vmatmul.mubr.f32.gmra.mrb[44].mxu0 %v1504_v27  ;;  %v1197_v15 = vmul.f32 %v4185_v21, %v3483_v14  ;;  %v3868_v37 = vmul.f32 %v1092_v51, %v3829_v39  ;;  %2381 = vtanh.f32 %v1321_v25  ;;  %v1258_v34 = vadd.f32 %v1194_v55, %v4183_v6  ;;  %v4189_v55 = vld [vmem:[#allocation26_spill] sm:$0xff] }
 0x1ff   : > { %v2374_v2 = vpop.eup %2373  ;;  %1852 = vmatmul.mubr.f32.gmra.mrb[44].mxu1 %v1506_v53  ;;  %v1199_v27 = vmul.f32 %v4188_v58, %v4187_v50  ;;  %v1323_v7 = vmul.f32 0.7978846, %v1259_v12  ;;  %v1320_v62 = vmul.f32 0.7978846, %v1256_v9  ;;  %v3875_v21 = vmul.f32 0.044715, %v3851_v20 }
 0x200   : > { %4186 = vst [vmem:[#allocation6_spill] sm:$0xff] %v3868_v37  ;;  %v2376_v8 = vpop.eup %2375  ;;  %v1445_v10 = vadd.f32 1.0, %v2374_v2  ;;  %v1261_v54 = vadd.f32 %v1197_v15, %v3483_v14  ;;  %v1322_v53 = vmul.f32 0.7978846, %v1258_v34  ;;  %v4190_v39 = vld [vmem:[#allocation34_spill] sm:$0xff]  ;;  %v3881_v12 = vmul.f32 %v1093_v45, %v3845_v52 }
 0x201   : > { %v1447_v47 = vadd.f32 1.0, %v2376_v8  ;;  %v1263_v51 = vadd.f32 %v1199_v27, %v4187_v50  ;;  %2383 = vtanh.f32 %v1323_v7  ;;  %v1196_v61 = vmul.f32 %v4190_v39, %v4189_v55  ;;  %v4191_v27 = vld [vmem:[#allocation28_spill] sm:$0xff] }
 0x202   : > { %v1509_v37 = vmul.f32 %v1445_v10, %v997_v63  ;;  %v1325_v25 = vmul.f32 0.7978846, %v1261_v54  ;;  %v2378_v58 = vpop.eup %2377  ;;  %2385 = vtanh.f32 %v1320_v62  ;;  %v4192_v63 = vld [vmem:[#allocation35_spill] sm:$0xff]  ;;  %v1001_v39 = vmul.f32 0.5, %v4176_v49  ;;  %v4193_v54 = vld [vmem:[#allocation42_spill] sm:$0xff] }
 0x203   : > { %v1511_v42 = vmul.f32 %v1447_v47, %v999_v4  ;;  %v1327_v9 = vmul.f32 0.7978846, %v1263_v51  ;;  %v1444_v2 = vadd.f32 1.0, %v2378_v58  ;;  %2387 = vtanh.f32 %v1322_v53  ;;  %v4194_v51 = vld [vmem:[#allocation38_spill] sm:$0xff] }
 0x204   : > { %v2380_v15 = vpop.eup %2379  ;;  %1711 = vmatprep.mubr.f32.mxu0 %v1509_v37  ;;  %v1260_v34 = vadd.f32 %v1196_v61, %v4189_v55  ;;  %v1198_v8 = vmul.f32 %v4192_v63, %v4191_v27  ;;  %2389 = vtanh.f32 %v1325_v25  ;;  %v1201_v47 = vmul.f32 %v3630_v0, %v3570_v43  ;;  %v4195_v0 = vld [vmem:[#allocation40_spill] sm:$0xff] }
 0x205   : > { %1856 = vmatprep.mubr.f32.mxu1 %v1511_v42  ;;  %v1446_v10 = vadd.f32 1.0, %v2380_v15  ;;  %v1508_v4 = vmul.f32 %v1444_v2, %v996_v13  ;;  %2391 = vtanh.f32 %v1327_v9  ;;  %v1003_v62 = vmul.f32 0.5, %v4178_v59  ;;  %v4196_v9 = vld [vmem:[#allocation39_spill] sm:$0xff]  ;;  %v4197_v15 = vld [vmem:[#allocation41_spill] sm:$0xff] }
 0x206   : > { %v1324_v45 = vmul.f32 0.7978846, %v1260_v34  ;;  %v1262_v37 = vadd.f32 %v1198_v8, %v4191_v27  ;;  %v1265_v61 = vadd.f32 %v1201_v47, %v3570_v43  ;;  %v1203_v42 = vmul.f32 %v4193_v54, %v3583_v28 }
 0x207   : > { %v1510_v7 = vmul.f32 %v1446_v10, %v998_v30  ;;  %1712 = vmatmul.mubr.f32.gmra.mrb[46].mxu0 %v1508_v4  ;;  %v1000_v49 = vmul.f32 0.5, %v4180_v17  ;;  %v1200_v13 = vmul.f32 %v4195_v0, %v4194_v51  ;;  %v1002_v58 = vmul.f32 0.5, %v4183_v6 }
 0x208   : > { %2393 = vtanh.f32 %v1324_v45  ;;  %v1326_v53 = vmul.f32 0.7978846, %v1262_v37  ;;  %v2382_v25 = vpop.eup %2381  ;;  %v1329_v30 = vmul.f32 0.7978846, %v1265_v61  ;;  %v1267_v59 = vadd.f32 %v1203_v42, %v3583_v28 }
 0x209   : > { %1857 = vmatmul.mubr.f32.gmra.mrb[46].mxu1 %v1510_v7  ;;  %v1202_v2 = vmul.f32 %v4197_v15, %v4196_v9  ;;  %v1449_v34 = vadd.f32 1.0, %v2382_v25  ;;  %v1005_v63 = vmul.f32 0.5, %v3483_v14  ;;  %v1264_v17 = vadd.f32 %v1200_v13, %v4194_v51 }
 0x20a   : > { %2395 = vtanh.f32 %v1326_v53  ;;  %v1331_v8 = vmul.f32 0.7978846, %v1267_v59  ;;  %v1205_v47 = vmul.f32 %v3686_v29, %v3640_v41  ;;  %v1007_v45 = vmul.f32 0.5, %v4187_v50 }
 0x20b   : > { %2397 = vtanh.f32 %v1329_v30  ;;  %v1266_v10 = vadd.f32 %v1202_v2, %v4196_v9  ;;  %v2384_v6 = vpop.eup %2383  ;;  %v1513_v4 = vmul.f32 %v1449_v34, %v1001_v39  ;;  %v1328_v37 = vmul.f32 0.7978846, %v1264_v17 }
 0x20c   : > { %v1207_v7 = vmul.f32 %v3707_v44, %v3671_v22  ;;  %v2386_v61 = vpop.eup %2385  ;;  %v1451_v14 = vadd.f32 1.0, %v2384_v6  ;;  %2399 = vtanh.f32 %v1331_v8  ;;  %v1269_v42 = vadd.f32 %v1205_v47, %v3640_v41 }
 0x20d   : > { %v1330_v54 = vmul.f32 0.7978846, %v1266_v10  ;;  %v2388_v53 = vpop.eup %2387  ;;  %1716 = vmatprep.mubr.f32.mxu0 %v1513_v4  ;;  %v1448_v0 = vadd.f32 1.0, %v2386_v61  ;;  %v1004_v13 = vmul.f32 0.5, %v4189_v55  ;;  %2401 = vtanh.f32 %v1328_v37 }
 0x20e   : > { %v1271_v29 = vadd.f32 %v1207_v7, %v3671_v22  ;;  %v2390_v39 = vpop.eup %2389  ;;  %v1515_v50 = vmul.f32 %v1451_v14, %v1003_v62  ;;  %v1450_v25 = vadd.f32 1.0, %v2388_v53  ;;  %v1333_v30 = vmul.f32 0.7978846, %v1269_v42 }
 0x20f   : > { %2403 = vtanh.f32 %v1330_v54  ;;  %v2392_v44 = vpop.eup %2391  ;;  %v1512_v59 = vmul.f32 %v1448_v0, %v1000_v49  ;;  %v1453_v15 = vadd.f32 1.0, %v2390_v39  ;;  %v1204_v34 = vmul.f32 %v3663_v19, %v3612_v38 }
 0x210   : > { %v1335_v2 = vmul.f32 0.7978846, %v1271_v29  ;;  %1861 = vmatprep.mubr.f32.mxu1 %v1515_v50  ;;  %v1514_v17 = vmul.f32 %v1450_v25, %v1002_v58  ;;  %v1455_v8 = vadd.f32 1.0, %v2392_v44  ;;  %v1006_v55 = vmul.f32 0.5, %v4191_v27 }
 0x211   : > { %2405 = vtanh.f32 %v1333_v30  ;;  %1717 = vmatmul.mubr.f32.gmra.mrb[48].mxu0 %v1512_v59  ;;  %v1517_v47 = vmul.f32 %v1453_v15, %v1005_v63  ;;  %v1268_v62 = vadd.f32 %v1204_v34, %v3612_v38  ;;  %v1206_v49 = vmul.f32 %v3666_v35, %v3616_v46  ;;  %v4200_v34 = vld [vmem:[#allocation2_spill] sm:$0xff] }
 0x212   : > { %v2394_v10 = vpop.eup %2393  ;;  %2407 = vtanh.f32 %v1335_v2  ;;  %1862 = vmatmul.mubr.f32.gmra.mrb[48].mxu1 %v1514_v17  ;;  %v1519_v6 = vmul.f32 %v1455_v8, %v1007_v45  ;;  %v1009_v19 = vmul.f32 0.5, %v3570_v43  ;;  %v1209_v58 = vmul.f32 %v3730_v11, %v3691_v32  ;;  %v4199_v2 = vld [vmem:[#allocation4_spill] sm:$0xff] }
 0x213   : > { %v1452_v4 = vadd.f32 1.0, %v2394_v10  ;;  %1721 = vmatprep.mubr.f32.mxu0 %v1517_v47  ;;  %v1011_v27 = vmul.f32 0.5, %v3583_v28  ;;  %v1332_v7 = vmul.f32 0.7978846, %v1268_v62  ;;  %v1270_v63 = vadd.f32 %v1206_v49, %v3616_v46 }
 0x214   : > { %v2396_v37 = vpop.eup %2395  ;;  %v1211_v61 = vmul.f32 %v3751_v5, %v3721_v36  ;;  %1866 = vmatprep.mubr.f32.mxu1 %v1519_v6  ;;  %v1008_v54 = vmul.f32 0.5, %v4194_v51  ;;  %v1273_v43 = vadd.f32 %v1209_v58, %v3691_v32  ;;  %v1010_v29 = vmul.f32 0.5, %v4196_v9  ;;  %v4198_v5 = vld [vmem:[#allocation11_spill] sm:$0xff] }
 0x215   : > { %v2398_v14 = vpop.eup %2397  ;;  %v1516_v35 = vmul.f32 %v1452_v4, %v1004_v13  ;;  %v1454_v45 = vadd.f32 1.0, %v2396_v37  ;;  %2409 = vtanh.f32 %v1332_v7  ;;  %v1334_v11 = vmul.f32 0.7978846, %v1270_v63 }
 0x216   : > { %v1457_v42 = vadd.f32 1.0, %v2398_v14  ;;  %v1275_v53 = vadd.f32 %v1211_v61, %v3721_v36  ;;  %v2400_v28 = vpop.eup %2399  ;;  %v1337_v39 = vmul.f32 0.7978846, %v1273_v43  ;;  %v1208_v50 = vmul.f32 %v4198_v5, %v3679_v23 }
 0x217   : > { %1722 = vmatmul.mubr.f32.gmra.mrb[50].mxu0 %v1516_v35  ;;  %v1518_v0 = vmul.f32 %v1454_v45, %v1006_v55  ;;  %v2402_v13 = vpop.eup %2401  ;;  %v1459_v30 = vadd.f32 1.0, %v2400_v28  ;;  %2411 = vtanh.f32 %v1334_v11  ;;  %v1210_v17 = vmul.f32 %v4200_v34, %v4199_v2 }
 0x218   : > { %v1521_v25 = vmul.f32 %v1457_v42, %v1009_v19  ;;  %v1339_v51 = vmul.f32 0.7978846, %v1275_v53  ;;  %v1456_v59 = vadd.f32 1.0, %v2402_v13  ;;  %2413 = vtanh.f32 %v1337_v39  ;;  %v4202_v53 = vld [vmem:[#allocation3_spill] sm:$0xff] }
 0x219   : > { %v2404_v44 = vpop.eup %2403  ;;  %1867 = vmatmul.mubr.f32.gmra.mrb[50].mxu1 %v1518_v0  ;;  %v1272_v15 = vadd.f32 %v1208_v50, %v3679_v23  ;;  %v1523_v9 = vmul.f32 %v1459_v30, %v1011_v27  ;;  %v1013_v55 = vmul.f32 0.5, %v3640_v41  ;;  %v1274_v49 = vadd.f32 %v1210_v17, %v4199_v2 }
 0x21a   : > { %1726 = vmatprep.mubr.f32.mxu0 %v1521_v25  ;;  %v1458_v8 = vadd.f32 1.0, %v2404_v44  ;;  %2415 = vtanh.f32 %v1339_v51  ;;  %v1520_v47 = vmul.f32 %v1456_v59, %v1008_v54  ;;  %v1213_v6 = vmul.f32 %v3773_v24, %v3738_v1 }
 0x21b   : > { %v2406_v10 = vpop.eup %2405  ;;  %v1336_v62 = vmul.f32 0.7978846, %v1272_v15  ;;  %1871 = vmatprep.mubr.f32.mxu1 %v1523_v9  ;;  %v1015_v37 = vmul.f32 0.5, %v3671_v22  ;;  %v1215_v27 = vmul.f32 %v3804_v18, %v3755_v31  ;;  %v1338_v7 = vmul.f32 0.7978846, %v1274_v49  ;;  %v4203_v9 = vld [vmem:[#allocation14_spill] sm:$0xff] }
 0x21c   : > { %v2408_v4 = vpop.eup %2407  ;;  %v1522_v19 = vmul.f32 %v1458_v8, %v1010_v29  ;;  %v1461_v58 = vadd.f32 1.0, %v2406_v10  ;;  %1727 = vmatmul.mubr.f32.gmra.mrb[52].mxu0 %v1520_v47  ;;  %v1277_v63 = vadd.f32 %v1213_v6, %v3738_v1  ;;  %v1159_v61 = vmul.f32 %v3875_v21, %v3851_v20  ;;  %v4201_v21 = vld [vmem:[#allocation7_spill] sm:$0xff]  ;;  %v4204_v49 = vld [vmem:[#allocation8_spill] sm:$0xff] }
 0x21d   : > { %v1463_v41 = vadd.f32 1.0, %v2408_v4  ;;  %2417 = vtanh.f32 %v1336_v62  ;;  %v1279_v14 = vadd.f32 %v1215_v27, %v3755_v31  ;;  %v1212_v35 = vmul.f32 %v3766_v16, %v3727_v56  ;;  %v4205_v6 = vld [vmem:[#allocation16_spill] sm:$0xff] }
 0x21e   : > { %1872 = vmatmul.mubr.f32.gmra.mrb[52].mxu1 %v1522_v19  ;;  %v1525_v24 = vmul.f32 %v1461_v58, %v1013_v55  ;;  %v1012_v45 = vmul.f32 0.5, %v3612_v38  ;;  %2419 = vtanh.f32 %v1338_v7  ;;  %v1341_v18 = vmul.f32 0.7978846, %v1277_v63 }
 0x21f   : > { %v1527_v22 = vmul.f32 %v1463_v41, %v1015_v37  ;;  %v2410_v54 = vpop.eup %2409  ;;  %v1014_v43 = vmul.f32 0.5, %v3616_v46  ;;  %v1343_v42 = vmul.f32 0.7978846, %v1279_v14  ;;  %v1276_v11 = vadd.f32 %v1212_v35, %v3727_v56 }
 0x220   : > { %1731 = vmatprep.mubr.f32.mxu0 %v1525_v24  ;;  %v1214_v28 = vmul.f32 %v4202_v53, %v4201_v21  ;;  %v1460_v0 = vadd.f32 1.0, %v2410_v54  ;;  %v1017_v29 = vmul.f32 0.5, %v3691_v32  ;;  %2421 = vtanh.f32 %v1341_v18  ;;  %v4206_v18 = vld [vmem:[#allocation5_spill] sm:$0xff]  ;;  %v4207_v54 = vld [vmem:[#allocation6_spill] sm:$0xff] }
 0x221   : > { %1876 = vmatprep.mubr.f32.mxu1 %v1527_v22  ;;  %v1217_v38 = vmul.f32 %v3823_v40, %v3791_v33  ;;  %v2412_v16 = vpop.eup %2411  ;;  %2423 = vtanh.f32 %v1343_v42  ;;  %v1340_v39 = vmul.f32 0.7978846, %v1276_v11  ;;  %v1219_v46 = vmul.f32 %v3834_v26, %v3798_v3 }
 0x222   : > { %v1278_v5 = vadd.f32 %v1214_v28, %v4201_v21  ;;  %v2414_v50 = vpop.eup %2413  ;;  %v1524_v13 = vmul.f32 %v1460_v0, %v1012_v45  ;;  %v1462_v25 = vadd.f32 1.0, %v2412_v16  ;;  %v1019_v30 = vmul.f32 0.5, %v3721_v36 }
 0x223   : > { %v1281_v51 = vadd.f32 %v1217_v38, %v3791_v33  ;;  %v1465_v44 = vadd.f32 1.0, %v2414_v50  ;;  %2425 = vtanh.f32 %v1340_v39  ;;  %v1283_v40 = vadd.f32 %v1219_v46, %v3798_v3 }
 0x224   : > { %v2416_v32 = vpop.eup %2415  ;;  %v1342_v59 = vmul.f32 0.7978846, %v1278_v5  ;;  %1732 = vmatmul.mubr.f32.gmra.mrb[54].mxu0 %v1524_v13  ;;  %v1526_v15 = vmul.f32 %v1462_v25, %v1014_v43  ;;  %v1216_v26 = vmul.f32 %v3816_v48, %v3781_v57  ;;  %v1158_v8 = vmul.f32 %v4203_v9, %v3840_v60 }
 0x225   : > { %v1467_v34 = vadd.f32 1.0, %v2416_v32  ;;  %v1345_v17 = vmul.f32 0.7978846, %v1281_v51  ;;  %v1529_v55 = vmul.f32 %v1465_v44, %v1017_v29  ;;  %v1347_v36 = vmul.f32 0.7978846, %v1283_v40 }
 0x226   : > { %2427 = vtanh.f32 %v1342_v59  ;;  %1877 = vmatmul.mubr.f32.gmra.mrb[54].mxu1 %v1526_v15  ;;  %v1280_v62 = vadd.f32 %v1216_v26, %v3781_v57  ;;  %v1218_v4 = vmul.f32 %v4205_v6, %v4204_v49  ;;  %v1016_v19 = vmul.f32 0.5, %v3679_v23 }
 0x227   : > { %v2418_v10 = vpop.eup %2417  ;;  %v1531_v47 = vmul.f32 %v1467_v34, %v1019_v30  ;;  %2429 = vtanh.f32 %v1345_v17  ;;  %1736 = vmatprep.mubr.f32.mxu0 %v1529_v55  ;;  %v1221_v48 = vmul.f32 %v3881_v12, %v3845_v52  ;;  %v1018_v27 = vmul.f32 0.5, %v4199_v2 }
 0x228   : > { %v1464_v58 = vadd.f32 1.0, %v2418_v10  ;;  %2431 = vtanh.f32 %v1347_v36  ;;  %v2420_v37 = vpop.eup %2419  ;;  %v1344_v41 = vmul.f32 0.7978846, %v1280_v62  ;;  %v1282_v7 = vadd.f32 %v1218_v4, %v4204_v49 }
 0x229   : > { %1881 = vmatprep.mubr.f32.mxu1 %v1531_v47  ;;  %v1223_v63 = vmul.f32 %v1159_v61, %v3851_v20  ;;  %v1466_v14 = vadd.f32 1.0, %v2420_v37  ;;  %v1021_v35 = vmul.f32 0.5, %v3738_v1  ;;  %v1285_v23 = vadd.f32 %v1221_v48, %v3845_v52 }
 0x22a   : > { %v1528_v24 = vmul.f32 %v1464_v58, %v1016_v19  ;;  %v2422_v22 = vpop.eup %2421  ;;  %2433 = vtanh.f32 %v1344_v41  ;;  %v1346_v45 = vmul.f32 0.7978846, %v1282_v7  ;;  %v1220_v43 = vmul.f32 %v4207_v54, %v4206_v18 }
 0x22b   : > { %v1287_v12 = vadd.f32 %v1223_v63, %v3851_v20  ;;  %v2424_v2 = vpop.eup %2423  ;;  %v1530_v42 = vmul.f32 %v1466_v14, %v1018_v27  ;;  %v1469_v11 = vadd.f32 1.0, %v2422_v22  ;;  %v1023_v61 = vmul.f32 0.5, %v3755_v31 }
 0x22c   : > { %1737 = vmatmul.mubr.f32.gmra.mrb[56].mxu0 %v1528_v24  ;;  %v1349_v53 = vmul.f32 0.7978846, %v1285_v23  ;;  %v1471_v28 = vadd.f32 1.0, %v2424_v2  ;;  %2435 = vtanh.f32 %v1346_v45  ;;  %v1284_v0 = vadd.f32 %v1220_v43, %v4206_v18 }
 0x22d   : > { %v1351_v1 = vmul.f32 0.7978846, %v1287_v12  ;;  %v2426_v29 = vpop.eup %2425  ;;  %1882 = vmatmul.mubr.f32.gmra.mrb[56].mxu1 %v1530_v42  ;;  %v1533_v38 = vmul.f32 %v1469_v11, %v1021_v35  ;;  %v1020_v16 = vmul.f32 0.5, %v3727_v56  ;;  %v1222_v39 = vmul.f32 %v1158_v8, %v3840_v60  ;;  %v3996_v35 = vld [vmem:[%s4057_s1 + $0x2] ss:$0 sm:$0xff] }
 0x22e   : > { %2437 = vtanh.f32 %v1349_v53  ;;  %v1535_v5 = vmul.f32 %v1471_v28, %v1023_v61  ;;  %v1468_v46 = vadd.f32 1.0, %v2426_v29  ;;  %v1348_v50 = vmul.f32 0.7978846, %v1284_v0 }
 0x22f   : > { %2439 = vtanh.f32 %v1351_v1  ;;  %1741 = vmatprep.mubr.f32.mxu0 %v1533_v38  ;;  %v1286_v31 = vadd.f32 %v1222_v39, %v3840_v60  ;;  %v1022_v51 = vmul.f32 0.5, %v4201_v21  ;;  %v1025_v56 = vmul.f32 0.5, %v3791_v33 }
 0x230   : > { %v2428_v13 = vpop.eup %2427  ;;  %1886 = vmatprep.mubr.f32.mxu1 %v1535_v5  ;;  %v1532_v30 = vmul.f32 %v1468_v46, %v1020_v16  ;;  %2441 = vtanh.f32 %v1348_v50  ;;  %v1027_v34 = vmul.f32 0.5, %v3798_v3  ;;  %v1024_v21 = vmul.f32 0.5, %v3781_v57 }
 0x231   : > { %v2430_v25 = vpop.eup %2429  ;;  %v1470_v32 = vadd.f32 1.0, %v2428_v13  ;;  %v1350_v40 = vmul.f32 0.7978846, %v1286_v31  ;;  %v1026_v47 = vmul.f32 0.5, %v4204_v49  ;;  %v1029_v3 = vmul.f32 0.5, %v3845_v52 }
 0x232   : > { %v2432_v44 = vpop.eup %2431  ;;  %v1473_v59 = vadd.f32 1.0, %v2430_v25  ;;  %1742 = vmatmul.mubr.f32.gmra.mrb[58].mxu0 %v1532_v30  ;;  %v1031_v58 = vmul.f32 0.5, %v3851_v20  ;;  %v1028_v41 = vmul.f32 0.5, %v4206_v18  ;;  %v1030_v52 = vmul.f32 0.5, %v3840_v60 }
 0x233   : > { %v1534_v15 = vmul.f32 %v1470_v32, %v1022_v51  ;;  %v1475_v17 = vadd.f32 1.0, %v2432_v44  ;;  %2443 = vtanh.f32 %v1350_v40 }
 0x234   : > { %v1537_v26 = vmul.f32 %v1473_v59, %v1025_v56  ;;  %v2434_v9 = vpop.eup %2433 }
 0x235   : > { %1887 = vmatmul.mubr.f32.gmra.mrb[58].mxu1 %v1534_v15  ;;  %v1539_v8 = vmul.f32 %v1475_v17, %v1027_v34  ;;  %v1472_v55 = vadd.f32 1.0, %v2434_v9 }
 0x236   : > { %1746 = vmatprep.mubr.f32.mxu0 %v1537_v26  ;;  %v2436_v36 = vpop.eup %2435 }
 0x237   : > { %1891 = vmatprep.mubr.f32.mxu1 %v1539_v8  ;;  %v1536_v33 = vmul.f32 %v1472_v55, %v1024_v21  ;;  %v1474_v62 = vadd.f32 1.0, %v2436_v36 }
 0x238   : > { %v2438_v10 = vpop.eup %2437 }
 0x239   : > { %v2440_v6 = vpop.eup %2439  ;;  %v1477_v4 = vadd.f32 1.0, %v2438_v10  ;;  %1747 = vmatmul.mubr.f32.gmra.mrb[60].mxu0 %v1536_v33  ;;  %v1538_v19 = vmul.f32 %v1474_v62, %v1026_v47 }
 0x23a   : > { %v1479_v48 = vadd.f32 1.0, %v2440_v6  ;;  %v2442_v37 = vpop.eup %2441 }
 0x23b   : > { %v1541_v27 = vmul.f32 %v1477_v4, %v1029_v3  ;;  %1892 = vmatmul.mubr.f32.gmra.mrb[60].mxu1 %v1538_v19  ;;  %v1476_v7 = vadd.f32 1.0, %v2442_v37 }
 0x23c   : > { %v1543_v57 = vmul.f32 %v1479_v48, %v1031_v58 }
 0x23d   : > { %1751 = vmatprep.mubr.f32.mxu0 %v1541_v27  ;;  %v2444_v63 = vpop.eup %2443  ;;  %v1540_v49 = vmul.f32 %v1476_v7, %v1028_v41 }
 0x23e   : > { %1896 = vmatprep.mubr.f32.mxu1 %v1543_v57  ;;  %v1478_v24 = vadd.f32 1.0, %v2444_v63 }
 0x23f   : > { %1752 = vmatmul.mubr.f32.gmra.mrb[62].mxu0 %v1540_v49 }
 0x240   : > { %v1542_v14 = vmul.f32 %v1478_v24, %v1030_v52 }
 0x242   : > { %1897 = vmatmul.mubr.f32.gmra.mrb[62].mxu1 %v1542_v14 }
 0x28c   : > { %v2052_v20 = vpop.f32.mrb[32].mxu0 }
 0x28d   : > { %v2053_v23 = vpop.f32.mrb[33].mxu0 }
 0x28e   : > { %v2054_v22 = vadd.f32 %v2053_v23, %v2052_v20 }
 0x290   : > { %v2132_v45 = vpop.f32.mrb[32].mxu1  ;;  %v1679_v12 = vadd.f32 %v2054_v22, %v3996_v35 }
 0x291   : > { %v2133_v18 = vpop.f32.mrb[33].mxu1 }
 0x292   : > { %v2134_v54 = vadd.f32 %v2133_v18, %v2132_v45 }
 0x294   : > { %v1824_v60 = vadd.f32 %v2134_v54, %v1679_v12 }
 0x296   : > { %1902 = vst.msk [vmem:[%s4004_s6] sm:$0xff] %vm244_vm0, %v1824_v60 }
 0x29e   : > { %v2055_v43 = vpop.f32.mrb[34].mxu0 }
 0x29f   : > { %v2056_v2 = vpop.f32.mrb[35].mxu0 }
 0x2a0   : > { %v2057_v42 = vadd.f32 %v2056_v2, %v2055_v43 }
 0x2a2   : > { %v2135_v11 = vpop.f32.mrb[34].mxu1  ;;  %v1684_v61 = vadd.f32 %v2057_v42, %v3996_v35 }
 0x2a3   : > { %v2136_v53 = vpop.f32.mrb[35].mxu1 }
 0x2a4   : > { %v2137_v28 = vadd.f32 %v2136_v53, %v2135_v11 }
 0x2a6   : > { %v1829_v1 = vadd.f32 %v2137_v28, %v1684_v61 }
 0x2a8   : > { %1903 = vst.msk [vmem:[%s4004_s6 + $0x8] sm:$0xff] %vm244_vm0, %v1829_v1 }
 0x2aa   : > { %v2058_v0 = vpop.f32.mrb[36].mxu0 }
 0x2ab   : > { %v2138_v29 = vpop.f32.mrb[36].mxu1  ;;  %v2059_v38 = vpop.f32.mrb[37].mxu0 }
 0x2ac   : > { %v2060_v16 = vadd.f32 %v2059_v38, %v2058_v0  ;;  %v2139_v39 = vpop.f32.mrb[37].mxu1 }
 0x2ad   : > { %v2140_v5 = vadd.f32 %v2139_v39, %v2138_v29 }
 0x2ae   : > { %v1689_v46 = vadd.f32 %v2060_v16, %v3996_v35 }
 0x2b0   : > { %v1834_v50 = vadd.f32 %v2140_v5, %v1689_v46 }
 0x2b1   : > { %v2061_v13 = vpop.f32.mrb[38].mxu0 }
 0x2b2   : > { %1904 = vst.msk [vmem:[%s4004_s6 + $0x10] sm:$0xff] %vm244_vm0, %v1834_v50  ;;  %v2141_v31 = vpop.f32.mrb[38].mxu1  ;;  %v2062_v25 = vpop.f32.mrb[39].mxu0 }
 0x2b3   : > { %v2063_v30 = vadd.f32 %v2062_v25, %v2061_v13  ;;  %v2142_v51 = vpop.f32.mrb[39].mxu1 }
 0x2b4   : > { %v2143_v32 = vadd.f32 %v2142_v51, %v2141_v31 }
 0x2b5   : > { %v1694_v44 = vadd.f32 %v2063_v30, %v3996_v35 }
 0x2b7   : > { %v1839_v56 = vadd.f32 %v2143_v32, %v1694_v44 }
 0x2b9   : > { %1905 = vst.msk [vmem:[%s4004_s6 + $0x18] sm:$0xff] %vm244_vm0, %v1839_v56 }
 0x2bc   : > { %v2064_v59 = vpop.f32.mrb[40].mxu0 }
 0x2bd   : > { %v2144_v40 = vpop.f32.mrb[40].mxu1  ;;  %v2065_v15 = vpop.f32.mrb[41].mxu0 }
 0x2be   : > { %v2066_v34 = vadd.f32 %v2065_v15, %v2064_v59  ;;  %v2145_v17 = vpop.f32.mrb[41].mxu1 }
 0x2bf   : > { %v2146_v26 = vadd.f32 %v2145_v17, %v2144_v40 }
 0x2c0   : > { %v1699_v9 = vadd.f32 %v2066_v34, %v3996_v35 }
 0x2c2   : > { %v1844_v8 = vadd.f32 %v2146_v26, %v1699_v9 }
 0x2c4   : > { %1906 = vst.msk [vmem:[%s4004_s6 + $0x20] sm:$0xff] %vm244_vm0, %v1844_v8 }
 0x2c6   : > { %v2067_v21 = vpop.f32.mrb[42].mxu0 }
 0x2c7   : > { %v2147_v55 = vpop.f32.mrb[42].mxu1  ;;  %v2068_v36 = vpop.f32.mrb[43].mxu0 }
 0x2c8   : > { %v2069_v10 = vadd.f32 %v2068_v36, %v2067_v21  ;;  %v2148_v33 = vpop.f32.mrb[43].mxu1 }
 0x2c9   : > { %v2149_v47 = vadd.f32 %v2148_v33, %v2147_v55 }
 0x2ca   : > { %v1704_v62 = vadd.f32 %v2069_v10, %v3996_v35 }
 0x2cc   : > { %v1849_v6 = vadd.f32 %v2149_v47, %v1704_v62 }
 0x2ce   : > { %1907 = vst.msk [vmem:[%s4004_s6 + $0x28] sm:$0xff] %vm244_vm0, %v1849_v6 }
 0x2d1   : > { %v2070_v3 = vpop.f32.mrb[44].mxu0 }
 0x2d2   : > { %v2150_v4 = vpop.f32.mrb[44].mxu1  ;;  %v2071_v19 = vpop.f32.mrb[45].mxu0 }
 0x2d3   : > { %v2072_v58 = vadd.f32 %v2071_v19, %v2070_v3  ;;  %v2151_v48 = vpop.f32.mrb[45].mxu1 }
 0x2d4   : > { %v2152_v37 = vadd.f32 %v2151_v48, %v2150_v4 }
 0x2d5   : > { %v1709_v27 = vadd.f32 %v2072_v58, %v3996_v35 }
 0x2d7   : > { %v1854_v57 = vadd.f32 %v2152_v37, %v1709_v27 }
 0x2d9   : > { %1908 = vst.msk [vmem:[%s4004_s6 + $0x30] sm:$0xff] %vm244_vm0, %v1854_v57 }
 0x2da   : > { %v2073_v41 = vpop.f32.mrb[46].mxu0 }
 0x2db   : > { %v2074_v63 = vpop.f32.mrb[47].mxu0 }
 0x2dc   : > { %v2153_v7 = vpop.f32.mrb[46].mxu1  ;;  %v2075_v49 = vadd.f32 %v2074_v63, %v2073_v41 }
 0x2dd   : > { %v2154_v52 = vpop.f32.mrb[47].mxu1 }
 0x2de   : > { %v2155_v24 = vadd.f32 %v2154_v52, %v2153_v7  ;;  %v1714_v14 = vadd.f32 %v2075_v49, %v3996_v35 }
 0x2e0   : > { %v1859_v20 = vadd.f32 %v2155_v24, %v1714_v14 }
 0x2e2   : > { %1909 = vst.msk [vmem:[%s4004_s6 + $0x38] sm:$0xff] %vm244_vm0, %v1859_v20 }
 0x2e4   : > { %v2076_v23 = vpop.f32.mrb[48].mxu0 }
 0x2e5   : > { %v2156_v22 = vpop.f32.mrb[48].mxu1  ;;  %v2077_v45 = vpop.f32.mrb[49].mxu0 }
 0x2e6   : > { %v2078_v12 = vadd.f32 %v2077_v45, %v2076_v23  ;;  %v2157_v18 = vpop.f32.mrb[49].mxu1 }
 0x2e7   : > { %v2158_v54 = vadd.f32 %v2157_v18, %v2156_v22 }
 0x2e8   : > { %v1719_v60 = vadd.f32 %v2078_v12, %v3996_v35 }
 0x2ea   : > { %v2079_v43 = vpop.f32.mrb[50].mxu0  ;;  %v1864_v2 = vadd.f32 %v2158_v54, %v1719_v60 }
 0x2eb   : > { %v2080_v42 = vpop.f32.mrb[51].mxu0 }
 0x2ec   : > { %v2159_v11 = vpop.f32.mrb[50].mxu1  ;;  %v2081_v61 = vadd.f32 %v2080_v42, %v2079_v43  ;;  %1910 = vst.msk [vmem:[%s4004_s6 + $0x40] sm:$0xff] %vm244_vm0, %v1864_v2 }
 0x2ed   : > { %v2160_v53 = vpop.f32.mrb[51].mxu1 }
 0x2ee   : > { %v1724_v28 = vadd.f32 %v2081_v61, %v3996_v35  ;;  %v2161_v1 = vadd.f32 %v2160_v53, %v2159_v11 }
 0x2ef   : > { %v2082_v29 = vpop.f32.mrb[52].mxu0 }
 0x2f0   : > { %v1869_v0 = vadd.f32 %v2161_v1, %v1724_v28  ;;  %v2083_v16 = vpop.f32.mrb[53].mxu0 }
 0x2f1   : > { %v2162_v38 = vpop.f32.mrb[52].mxu1  ;;  %v2084_v39 = vadd.f32 %v2083_v16, %v2082_v29 }
 0x2f2   : > { %1911 = vst.msk [vmem:[%s4004_s6 + $0x48] sm:$0xff] %vm244_vm0, %v1869_v0  ;;  %v2163_v5 = vpop.f32.mrb[53].mxu1 }
 0x2f3   : > { %v2164_v46 = vadd.f32 %v2163_v5, %v2162_v38  ;;  %v1729_v50 = vadd.f32 %v2084_v39, %v3996_v35 }
 0x2f5   : > { %v1874_v13 = vadd.f32 %v2164_v46, %v1729_v50 }
 0x2f7   : > { %1912 = vst.msk [vmem:[%s4004_s6 + $0x50] sm:$0xff] %vm244_vm0, %v1874_v13  ;;  %v2085_v31 = vpop.f32.mrb[54].mxu0 }
 0x2f8   : > { %v2086_v25 = vpop.f32.mrb[55].mxu0 }
 0x2f9   : > { %v2165_v30 = vpop.f32.mrb[54].mxu1  ;;  %v2087_v51 = vadd.f32 %v2086_v25, %v2085_v31 }
 0x2fa   : > { %v2166_v32 = vpop.f32.mrb[55].mxu1 }
 0x2fb   : > { %v1734_v44 = vadd.f32 %v2087_v51, %v3996_v35  ;;  %v2167_v56 = vadd.f32 %v2166_v32, %v2165_v30 }
 0x2fd   : > { %v1879_v59 = vadd.f32 %v2167_v56, %v1734_v44 }
 0x2ff   : > { %v2088_v40 = vpop.f32.mrb[56].mxu0  ;;  %1913 = vst.msk [vmem:[%s4004_s6 + $0x58] sm:$0xff] %vm244_vm0, %v1879_v59 }
 0x300   : > { %v2089_v15 = vpop.f32.mrb[57].mxu0  ;;  %v2168_v34 = vpop.f32.mrb[56].mxu1 }
 0x301   : > { %v2090_v17 = vadd.f32 %v2089_v15, %v2088_v40  ;;  %v2169_v26 = vpop.f32.mrb[57].mxu1 }
 0x302   : > { %v2170_v8 = vadd.f32 %v2169_v26, %v2168_v34 }
 0x303   : > { %v1739_v9 = vadd.f32 %v2090_v17, %v3996_v35 }
 0x305   : > { %v1884_v21 = vadd.f32 %v2170_v8, %v1739_v9  ;;  %v2091_v55 = vpop.f32.mrb[58].mxu0 }
 0x306   : > { %v2092_v36 = vpop.f32.mrb[59].mxu0 }
 0x307   : > { %1914 = vst.msk [vmem:[%s4004_s6 + $0x60] sm:$0xff] %vm244_vm0, %v1884_v21  ;;  %v2093_v33 = vadd.f32 %v2092_v36, %v2091_v55 }
 0x308   : > { %v2171_v10 = vpop.f32.mrb[58].mxu1 }
 0x309   : > { %v2172_v47 = vpop.f32.mrb[59].mxu1  ;;  %v1744_v62 = vadd.f32 %v2093_v33, %v3996_v35 }
 0x30a   : > { %v2173_v6 = vadd.f32 %v2172_v47, %v2171_v10 }
 0x30c   : > { %v1889_v3 = vadd.f32 %v2173_v6, %v1744_v62  ;;  %v2094_v4 = vpop.f32.mrb[60].mxu0 }
 0x30d   : > { %v2095_v19 = vpop.f32.mrb[61].mxu0 }
 0x30e   : > { %1915 = vst.msk [vmem:[%s4004_s6 + $0x68] sm:$0xff] %vm244_vm0, %v1889_v3  ;;  %v2174_v58 = vpop.f32.mrb[60].mxu1  ;;  %v2096_v48 = vadd.f32 %v2095_v19, %v2094_v4 }
 0x30f   : > { %v2175_v37 = vpop.f32.mrb[61].mxu1 }
 0x310   : > { %v1749_v27 = vadd.f32 %v2096_v48, %v3996_v35  ;;  %v2176_v57 = vadd.f32 %v2175_v37, %v2174_v58 }
 0x312   : > { %v1894_v41 = vadd.f32 %v2176_v57, %v1749_v27  ;;  %v2097_v7 = vpop.f32.mrb[62].mxu0 }
 0x313   : > { %v2098_v63 = vpop.f32.mrb[63].mxu0 }
 0x314   : > { %1916 = vst.msk [vmem:[%s4004_s6 + $0x70] sm:$0xff] %vm244_vm0, %v1894_v41  ;;  %v2099_v49 = vadd.f32 %v2098_v63, %v2097_v7 }
 0x315   : > { %v2177_v52 = vpop.f32.mrb[62].mxu1 }
 0x316   : > { %v1754_v24 = vadd.f32 %v2099_v49, %v3996_v35  ;;  %v2178_v14 = vpop.f32.mrb[63].mxu1 }
 0x317   : > { %v2179_v20 = vadd.f32 %v2178_v14, %v2177_v52 }
 0x319   : > { %v1899_v23 = vadd.f32 %v2179_v20, %v1754_v24 }
 0x31b   : > { %1917 = vst.msk [vmem:[%s4004_s6 + $0x78] sm:$0xff] %vm244_vm0, %v1899_v23 }
 0x31c PF: > { %s15_s18 = sadd.s32 1, %s2451_s18  }
 0x31d   : > { %p12_p4 = scmp.ge.s32.totalorder %s15_s18, 6  }
 0x31f   :  { %14 = sbr.rel (!%p12_p4) target bundleno = 1 (0x1), region = 70 }

</bundles_post_ra>
